<compile_context>
chip_gen: v7x
topology: tpu7x:2x2x1
jax: 0.10.0
libtpu: 0.0.40
codegen_flags: <defaults>
</compile_context>

<pallas_src>
import functools
import math

import jax
import jax.numpy as jnp
from jax.experimental import pallas as pl
from jax.experimental.pallas import tpu as pltpu


# ----------------------------------------------------------------------------
# Pallas kernel: whole GraphNetBlock forward for one tile of query rows.
# ----------------------------------------------------------------------------
def _gnb_kernel(
    node_ref, rec_ref, send_ref, adj_ref,
    send_bd_ref, wcat_ref, wm_ref,
    br_ref, bs_ref, bm_ref,
    bidx_ref, hidx_ref,
    g_rec_ref, b_rec_ref, g_send_ref, b_send_ref, g_node_ref, b_node_ref,
    out_ref,
    *, feat, num_heads, head_dim, matmul_dtype,
):
    F = feat
    H = num_heads
    f32 = jnp.float32
    mdt = matmul_dtype

    node = node_ref[...].astype(f32)
    rec = rec_ref[...].astype(f32)
    send = send_ref[...].astype(f32)
    T = node.shape[0]

    def leaky(x):
        return jnp.where(x >= 0, x, 0.2 * x)   # nn.LeakyReLU(negative_slope=0.2)

    def layernorm(x, g_ref, b_ref):
        mu = jnp.mean(x, axis=-1, keepdims=True)
        var = jnp.mean((x - mu) ** 2, axis=-1, keepdims=True)
        return (x - mu) * jax.lax.rsqrt(var + 1e-5) * g_ref[...] + b_ref[...]

    # ---------------- fused projections: 2 MXU calls ----------------
    proj = jnp.dot(node.astype(mdt), wcat_ref[...],
                   preferred_element_type=f32)                          # (T, 3F)
    # NOTE: this (2T, F) sublane concat makes a small VMEM copy per step, but it
    # doubles the row fill of the single Wm MXU push; measured as a wash at this size.
    rs = jnp.concatenate([rec, send], axis=0).astype(mdt)               # (2T, F)
    mem = jnp.dot(rs, wm_ref[...], preferred_element_type=f32) + bm_ref[...]

    proj_r = proj[:, :F]
    proj_s = proj[:, F:2 * F]
    q = proj[:, 2 * F:]                                                 # query projection
    mem_r = mem[:T]
    mem_s = mem[T:]

    # ---------------- edge feature update ----------------
    next_rec = layernorm(leaky(proj_r + br_ref[...] + mem_r), g_rec_ref, b_rec_ref)
    next_send = layernorm(leaky(proj_s + bs_ref[...] + mem_s), g_send_ref, b_send_ref)

    # ---------------- node feature update (multi-head attention) ----------------
    scale = 1.0 / math.sqrt(head_dim)
    NEG = jnp.float32(-1e30)     # finite mask value: no -inf -> NaN on zero-degree rows

    # q_h @ s_h^T for ALL heads in ONE MXU call: (T, F) x (H*N, F)^T -> (T, H*N)
    qs_all = jax.lax.dot_general(q.astype(mdt), send_bd_ref[...],
                                 (((1,), (1,)), ((), ())),
                                 preferred_element_type=f32)

    # single-copy (T, N) adjacency, broadcast across the H head lane-groups in-kernel
    valid = jnp.tile(adj_ref[...], (1, H)) != 0                          # (T, H*N)
    # NOTE: the q·rec term of the reference is constant over senders within a head,
    # so it cancels under the per-head softmax and is omitted here (output unchanged).
    logits = jnp.where(valid, qs_all * scale, NEG)

    # Per-head softmax over the sender axis with deferred normalization.
    # Global row max >= every per-head max, so it is a valid (cheaper) stabilizer.
    m = jnp.max(logits, axis=-1, keepdims=True)
    e = jnp.exp(logits - m)                                              # masked -> 0

    # aggregate first, normalize once per output lane
    unnorm = jnp.dot(e.astype(mdt), send_bd_ref[...],
                     preferred_element_type=f32)                         # (T, F)
    denom = jnp.dot(e, bidx_ref[...], preferred_element_type=f32)        # (T, H)
    denom = jnp.maximum(denom, jnp.float32(1e-30))   # guard per-head fully-masked rows
    denom_f = jnp.dot(denom, hidx_ref[...], preferred_element_type=f32)  # (T, F)
    # NOTE: pl.reciprocal(denom_f, approx=True) is a free EUP win in production;
    #       exact divide kept so the f32 check against the reference stays tight.
    aggr = unnorm / denom_f
    # TODO(synk): nn.Dropout(p=0.2) on attention scores is identity here (eval mode);
    #             training-mode stochastic dropout is not reproduced.

    next_node = layernorm(leaky(rec + aggr), g_node_ref, b_node_ref)

    # ---------------- residuals, single lane-dense output slab ----------------
    out = jnp.concatenate(
        [next_node + node, next_rec + rec, next_send + send], axis=-1)   # (T, 3F)
    lane_pad = out_ref.shape[-1] - out.shape[-1]
    if lane_pad:
        out = jnp.concatenate([out, jnp.zeros((T, lane_pad), f32)], axis=-1)
    out_ref[...] = out.astype(out_ref.dtype)


# ----------------------------------------------------------------------------
# Wrapper: host-side layout prep + tiled pallas_call.
# ----------------------------------------------------------------------------
def _round_up(x, m):
    return ((x + m - 1) // m) * m


def graph_net_block(node, rec, send, adj, params, num_heads, *,
                    tile_q=None, matmul_dtype=jnp.float32):
    N, F = node.shape
    H = num_heads
    D = F // H
    HN = H * N
    OUTW = _round_up(3 * F, 128)          # lane-dense output slab width
    msize = jnp.dtype(matmul_dtype).itemsize

    # ---- VMEM estimate: residents + double-buffered tiles + live intermediates ----
    def vmem_estimate(t):
        resident = (HN * F * msize            # send_bd
                    + 3 * F * F * msize       # wcat
                    + F * F * msize           # wm
                    + HN * H * 4 + H * F * 4  # bmat + hmat
                    + 9 * F * 4)              # biases / LN params
        tiled = 2 * (3 * t * F * 4 + t * N + t * OUTW * 4)
        live = 3 * t * HN * 4 + 4 * t * F * 4 + 2 * t * 3 * F * 4
        return resident + tiled + live

    # ---- tile_q: fill the MXU M dimension, but respect the VMEM budget ----
    if tile_q is None:
        tile_q = min(_round_up(N, 8), 256)
    tile_q = max(8, _round_up(min(tile_q, _round_up(N, 8)), 8))
    budget = 24 * 2**20       # stay under the 32 MiB default scoped VMEM (v7x-safe)
    while tile_q > 8 and vmem_estimate(tile_q) > budget:
        tile_q = max(8, _round_up(tile_q // 2, 8))

    # pad query rows instead of silently degrading to one full-N tile
    N_pad = _round_up(N, tile_q)
    if N_pad != N:
        padr = N_pad - N
        node_p = jnp.pad(node, ((0, padr), (0, 0)))
        rec_p = jnp.pad(rec, ((0, padr), (0, 0)))
        send_p = jnp.pad(send, ((0, padr), (0, 0)))
        adj_p = jnp.pad(adj, ((0, padr), (0, 0)))
    else:
        node_p, rec_p, send_p, adj_p = node, rec, send, adj

    # single-copy int8 adjacency (NOT replicated per head)
    adj_i8 = (adj_p != 0).astype(jnp.int8)                               # (N_pad, N)

    # pre-transposed / fused weights (stored (in, out); no in-kernel transposes)
    wcat = jnp.concatenate(
        [params["wr"].T, params["ws"].T, params["wq"].T], axis=1).astype(matmul_dtype)
    wm_t = params["wm"].T.astype(matmul_dtype)                           # (F, F)

    # tiny 0/1 head-indicator matrices
    heads = jnp.arange(H)
    bmat = (jnp.arange(HN)[:, None] // N == heads[None, :]).astype(jnp.float32)  # (HN, H)
    hmat = (heads[:, None] == jnp.arange(F)[None, :] // D).astype(jnp.float32)   # (H, F)

    # head-block-diagonal expansion of the (un-padded) senders:
    #   send_bd[h*N+n, f] = send[n, f] * (f // D == h)
    # TODO(synk): for very large graphs on v7x (64 MiB VMEM) tile the sender axis
    #             (flash-style running max/denominator) instead of keeping it resident.
    send_bd = (jnp.tile(send, (H, 1)) *
               ((jnp.arange(HN)[:, None] // N) == (jnp.arange(F)[None, :] // D))
               ).astype(matmul_dtype)                                    # (HN, F)

    kernel = functools.partial(_gnb_kernel, feat=F, num_heads=H, head_dim=D,
                               matmul_dtype=matmul_dtype)

    def tiled(last):
        return pl.BlockSpec((tile_q, last), lambda i: (i, 0))

    def resident(shape):
        return pl.BlockSpec(shape, lambda i: (0, 0))

    in_specs = [
        tiled(F),               # node
        tiled(F),               # rec
        tiled(F),               # send
        tiled(N),               # adjacency (int8, single copy)
        resident((HN, F)),      # send_bd (resident across query tiles)
        resident((F, 3 * F)),   # wcat
        resident((F, F)),       # wm_t
        resident((1, F)),       # br
        resident((1, F)),       # bs
        resident((1, F)),       # bm
        resident((HN, H)),      # bmat
        resident((H, F)),       # hmat
        resident((1, F)),       # g_rec
        resident((1, F)),       # b_rec
        resident((1, F)),       # g_send
        resident((1, F)),       # b_send
        resident((1, F)),       # g_node
        resident((1, F)),       # b_node
    ]

    vmem_limit = int(min(96 * 2**20, max(32 * 2**20, 2 * vmem_estimate(tile_q))))

    out = pl.pallas_call(
        kernel,
        out_shape=jax.ShapeDtypeStruct((N_pad, OUTW), node.dtype),
        grid=(N_pad // tile_q,),
        in_specs=in_specs,
        out_specs=pl.BlockSpec((tile_q, OUTW), lambda i: (i, 0)),
        compiler_params=pltpu.CompilerParams(
            dimension_semantics=("parallel",),    # megacore sharding on v7x
            vmem_limit_bytes=vmem_limit,
        ),
    )(node_p, rec_p, send_p, adj_i8, send_bd, wcat, wm_t,
      params["br"], params["bs"], params["bm"],
      bmat, hmat,
      params["g_rec"], params["b_rec"],
      params["g_send"], params["b_send"],
      params["g_node"], params["b_node"])

    return out[:N, :F], out[:N, F:2 * F], out[:N, 2 * F:3 * F]


# ----------------------------------------------------------------------------
# Pure-JAX reference (mirrors the PyTorch forward) for validation.
# ----------------------------------------------------------------------------
def reference(node, rec, send, adj, p, num_heads):
    def lin(x, w, b=None):
        y = x @ w.T
        return y + b if b is not None else y

    leaky = lambda x: jnp.where(x >= 0, x, 0.2 * x)

    def ln(x, g, b):
        mu = x.mean(-1, keepdims=True)
        var = ((x - mu) ** 2).mean(-1, keepdims=True)
        return (x - mu) / jnp.sqrt(var + 1e-5) * g + b

    nr = lin(node, p["wr"], p["br"]) + lin(rec, p["wm"], p["bm"])
    ns = lin(node, p["ws"], p["bs"]) + lin(send, p["wm"], p["bm"])
    nr = ln(leaky(nr), p["g_rec"], p["b_rec"])
    ns = ln(leaky(ns), p["g_send"], p["b_send"])

    N, F = node.shape
    D = F // num_heads
    q = node @ p["wq"].T
    qh = q.reshape(N, num_heads, D)
    rh = rec.reshape(N, num_heads, D)
    sh = send.reshape(N, num_heads, D)
    qr = jnp.einsum("ijk,ijk->ji", qh, rh)[:, :, None]   # (H, N, 1)
    qs = jnp.einsum("ijk,ljk->jil", qh, sh)              # (H, N, N)
    attn = qr + qs
    attn = jnp.where(adj[None] == 0, -jnp.inf, attn) / math.sqrt(D)
    attn = jax.nn.softmax(attn, axis=2)
    aggr = jnp.einsum("ijk,kil->jil", attn, sh).reshape(N, F)
    nn_ = ln(leaky(rec + aggr), p["g_node"], p["b_node"])
    return nn_ + node, nr + rec, ns + send


# ----------------------------------------------------------------------------
# Main
# ----------------------------------------------------------------------------
if __name__ == "__main__":
    N = 64           # number of nodes
    F = 32           # output_size
    H = 4            # num_heads  (hidden_size = 8)

    key = jax.random.PRNGKey(0)
    keys = jax.random.split(key, 12)

    node = jax.random.normal(keys[0], (N, F), jnp.float32)
    rec = jax.random.normal(keys[1], (N, F), jnp.float32)
    send = jax.random.normal(keys[2], (N, F), jnp.float32)
    adj_rand = jax.random.bernoulli(keys[3], 0.5, (N, N)).astype(jnp.float32)
    adj = jnp.maximum(adj_rand, jnp.eye(N, dtype=jnp.float32))  # self-loops

    def w(k):
        return jax.random.normal(k, (F, F), jnp.float32) * 0.1

    def b(k):
        return jax.random.normal(k, (1, F), jnp.float32) * 0.1

    params = {
        "wq": w(keys[4]),
        "wr": w(keys[5]), "br": b(keys[6]),
        "ws": w(keys[7]), "bs": b(keys[8]),
        "wm": w(keys[9]), "bm": b(keys[10]),
        # LayerNorm affine params: PyTorch defaults (gamma=1, beta=0)
        "g_rec": jnp.ones((1, F), jnp.float32), "b_rec": jnp.zeros((1, F), jnp.float32),
        "g_send": jnp.ones((1, F), jnp.float32), "b_send": jnp.zeros((1, F), jnp.float32),
        "g_node": jnp.ones((1, F), jnp.float32), "b_node": jnp.zeros((1, F), jnp.float32),
    }

    # default tile_q: single grid step at this small N (per review), larger N auto-tiles
    out_node, out_rec, out_send = graph_net_block(node, rec, send, adj, params, H)
    jax.block_until_ready((out_node, out_rec, out_send))

    ref_node, ref_rec, ref_send = reference(node, rec, send, adj, params, H)
    assert jnp.allclose(out_node, ref_node, atol=2e-4, rtol=2e-4), \
        float(jnp.max(jnp.abs(out_node - ref_node)))
    assert jnp.allclose(out_rec, ref_rec, atol=2e-4, rtol=2e-4), \
        float(jnp.max(jnp.abs(out_rec - ref_rec)))
    assert jnp.allclose(out_send, ref_send, atol=2e-4, rtol=2e-4), \
        float(jnp.max(jnp.abs(out_send - ref_send)))

    print("KERNEL_OK")
</pallas_src>

<mosaic_0001>
module attributes {stable_mosaic.version = 11 : i64} {
  func.func @_gnb_kernel(%arg0: i32, %arg1: memref<64x32xf32, #tpu.memory_space<vmem>>, %arg2: memref<64x32xf32, #tpu.memory_space<vmem>>, %arg3: memref<64x32xf32, #tpu.memory_space<vmem>>, %arg4: memref<64x64xi8, #tpu.memory_space<vmem>>, %arg5: memref<256x32xf32, #tpu.memory_space<vmem>>, %arg6: memref<32x96xf32, #tpu.memory_space<vmem>>, %arg7: memref<32x32xf32, #tpu.memory_space<vmem>>, %arg8: memref<1x32xf32, #tpu.memory_space<vmem>>, %arg9: memref<1x32xf32, #tpu.memory_space<vmem>>, %arg10: memref<1x32xf32, #tpu.memory_space<vmem>>, %arg11: memref<256x4xf32, #tpu.memory_space<vmem>>, %arg12: memref<4x32xf32, #tpu.memory_space<vmem>>, %arg13: memref<1x32xf32, #tpu.memory_space<vmem>>, %arg14: memref<1x32xf32, #tpu.memory_space<vmem>>, %arg15: memref<1x32xf32, #tpu.memory_space<vmem>>, %arg16: memref<1x32xf32, #tpu.memory_space<vmem>>, %arg17: memref<1x32xf32, #tpu.memory_space<vmem>>, %arg18: memref<1x32xf32, #tpu.memory_space<vmem>>, %arg19: memref<64x128xf32, #tpu.memory_space<vmem>>) attributes {dimension_semantics = [#tpu.dimension_semantics<parallel>], iteration_bounds = array<i64: 1>, scalar_prefetch = 0 : i64, scratch_operands = 0 : i64, tpu.core_type = #tpu.core_type<tc>, window_params = [{transform_indices = @transform_0, window_bounds = array<i64: 64, 32>}, {transform_indices = @transform_1, window_bounds = array<i64: 64, 32>}, {transform_indices = @transform_2, window_bounds = array<i64: 64, 32>}, {transform_indices = @transform_3, window_bounds = array<i64: 64, 64>}, {pipeline_mode = #tpu.pipeline_mode<synchronous>, transform_indices = @transform_4, window_bounds = array<i64: 256, 32>}, {pipeline_mode = #tpu.pipeline_mode<synchronous>, transform_indices = @transform_5, window_bounds = array<i64: 32, 96>}, {pipeline_mode = #tpu.pipeline_mode<synchronous>, transform_indices = @transform_6, window_bounds = array<i64: 32, 32>}, {pipeline_mode = #tpu.pipeline_mode<synchronous>, transform_indices = @transform_7, window_bounds = array<i64: 1, 32>}, {pipeline_mode = #tpu.pipeline_mode<synchronous>, transform_indices = @transform_8, window_bounds = array<i64: 1, 32>}, {pipeline_mode = #tpu.pipeline_mode<synchronous>, transform_indices = @transform_9, window_bounds = array<i64: 1, 32>}, {pipeline_mode = #tpu.pipeline_mode<synchronous>, transform_indices = @transform_10, window_bounds = array<i64: 256, 4>}, {pipeline_mode = #tpu.pipeline_mode<synchronous>, transform_indices = @transform_11, window_bounds = array<i64: 4, 32>}, {pipeline_mode = #tpu.pipeline_mode<synchronous>, transform_indices = @transform_12, window_bounds = array<i64: 1, 32>}, {pipeline_mode = #tpu.pipeline_mode<synchronous>, transform_indices = @transform_13, window_bounds = array<i64: 1, 32>}, {pipeline_mode = #tpu.pipeline_mode<synchronous>, transform_indices = @transform_14, window_bounds = array<i64: 1, 32>}, {pipeline_mode = #tpu.pipeline_mode<synchronous>, transform_indices = @transform_15, window_bounds = array<i64: 1, 32>}, {pipeline_mode = #tpu.pipeline_mode<synchronous>, transform_indices = @transform_16, window_bounds = array<i64: 1, 32>}, {pipeline_mode = #tpu.pipeline_mode<synchronous>, transform_indices = @transform_17, window_bounds = array<i64: 1, 32>}, {transform_indices = @transform_18, window_bounds = array<i64: 64, 128>}]} {
    %c0 = arith.constant 0 : index
    %c0_0 = arith.constant 0 : index
    %0 = vector.load %arg1[%c0, %c0_0] : memref<64x32xf32, #tpu.memory_space<vmem>>, vector<64x32xf32>
    %c0_1 = arith.constant 0 : index
    %c0_2 = arith.constant 0 : index
    %1 = vector.load %arg2[%c0_1, %c0_2] : memref<64x32xf32, #tpu.memory_space<vmem>>, vector<64x32xf32>
    %c0_3 = arith.constant 0 : index
    %c0_4 = arith.constant 0 : index
    %2 = vector.load %arg3[%c0_3, %c0_4] : memref<64x32xf32, #tpu.memory_space<vmem>>, vector<64x32xf32>
    %c0_5 = arith.constant 0 : index
    %c0_6 = arith.constant 0 : index
    %3 = vector.load %arg6[%c0_5, %c0_6] : memref<32x96xf32, #tpu.memory_space<vmem>>, vector<32x96xf32>
    %cst = arith.constant dense<0.000000e+00> : vector<64x96xf32>
    %4 = tpu.matmul %0, %3, %cst {dimension_numbers = #tpu.dot_dimension_numbers<[1], [0], [0], [1], [0, 0, 1, 1], [], []>} : vector<64x32xf32>, vector<32x96xf32>, vector<64x96xf32> -> vector<64x96xf32>
    %5 = tpu.concatenate %1, %2 in 0 : vector<64x32xf32>, vector<64x32xf32> -> vector<128x32xf32>
    %c0_7 = arith.constant 0 : index
    %c0_8 = arith.constant 0 : index
    %6 = vector.load %arg7[%c0_7, %c0_8] : memref<32x32xf32, #tpu.memory_space<vmem>>, vector<32x32xf32>
    %cst_9 = arith.constant dense<0.000000e+00> : vector<128x32xf32>
    %7 = tpu.matmul %5, %6, %cst_9 {dimension_numbers = #tpu.dot_dimension_numbers<[1], [0], [0], [1], [0, 0, 1, 1], [], []>} : vector<128x32xf32>, vector<32x32xf32>, vector<128x32xf32> -> vector<128x32xf32>
    %c0_10 = arith.constant 0 : index
    %c0_11 = arith.constant 0 : index
    %8 = vector.load %arg10[%c0_10, %c0_11] : memref<1x32xf32, #tpu.memory_space<vmem>>, vector<1x32xf32>
    %9 = vector.broadcast %8 : vector<1x32xf32> to vector<128x32xf32>
    %10 = arith.addf %7, %9 : vector<128x32xf32>
    %11 = vector.extract_strided_slice %4 {offsets = [0, 0], sizes = [64, 32], strides = [1, 1]} : vector<64x96xf32> to vector<64x32xf32>
    %12 = vector.extract_strided_slice %4 {offsets = [0, 32], sizes = [64, 32], strides = [1, 1]} : vector<64x96xf32> to vector<64x32xf32>
    %13 = vector.extract_strided_slice %4 {offsets = [0, 64], sizes = [64, 32], strides = [1, 1]} : vector<64x96xf32> to vector<64x32xf32>
    %14 = vector.extract_strided_slice %10 {offsets = [0, 0], sizes = [64, 32], strides = [1, 1]} : vector<128x32xf32> to vector<64x32xf32>
    %15 = vector.extract_strided_slice %10 {offsets = [64, 0], sizes = [64, 32], strides = [1, 1]} : vector<128x32xf32> to vector<64x32xf32>
    %c0_12 = arith.constant 0 : index
    %c0_13 = arith.constant 0 : index
    %16 = vector.load %arg8[%c0_12, %c0_13] : memref<1x32xf32, #tpu.memory_space<vmem>>, vector<1x32xf32>
    %17 = vector.broadcast %16 : vector<1x32xf32> to vector<64x32xf32>
    %18 = arith.addf %11, %17 : vector<64x32xf32>
    %19 = arith.addf %18, %14 : vector<64x32xf32>
    %cst_14 = arith.constant 0.000000e+00 : f32
    %20 = vector.broadcast %cst_14 : f32 to vector<64x32xf32>
    %21 = arith.cmpf oge, %19, %20 : vector<64x32xf32>
    %cst_15 = arith.constant 2.000000e-01 : f32
    %22 = vector.broadcast %cst_15 : f32 to vector<64x32xf32>
    %23 = arith.mulf %22, %19 : vector<64x32xf32>
    %24 = arith.select %21, %19, %23 : vector<64x32xi1>, vector<64x32xf32>
    %cst_16 = arith.constant dense<0.000000e+00> : vector<64xf32>
    %25 = vector.multi_reduction <add>, %24, %cst_16 [1] : vector<64x32xf32> to vector<64xf32>
    %26 = vector.shape_cast %25 : vector<64xf32> to vector<64x1xf32>
    %cst_17 = arith.constant 3.200000e+01 : f32
    %27 = vector.broadcast %cst_17 : f32 to vector<64x1xf32>
    %28 = arith.divf %26, %27 : vector<64x1xf32>
    %29 = vector.broadcast %28 : vector<64x1xf32> to vector<64x32xf32>
    %30 = arith.subf %24, %29 : vector<64x32xf32>
    %31 = arith.mulf %30, %30 : vector<64x32xf32>
    %cst_18 = arith.constant dense<0.000000e+00> : vector<64xf32>
    %32 = vector.multi_reduction <add>, %31, %cst_18 [1] : vector<64x32xf32> to vector<64xf32>
    %33 = vector.shape_cast %32 : vector<64xf32> to vector<64x1xf32>
    %cst_19 = arith.constant 3.200000e+01 : f32
    %34 = vector.broadcast %cst_19 : f32 to vector<64x1xf32>
    %35 = arith.divf %33, %34 : vector<64x1xf32>
    %36 = vector.broadcast %28 : vector<64x1xf32> to vector<64x32xf32>
    %37 = arith.subf %24, %36 : vector<64x32xf32>
    %cst_20 = arith.constant 9.99999974E-6 : f32
    %38 = vector.broadcast %cst_20 : f32 to vector<64x1xf32>
    %39 = arith.addf %35, %38 : vector<64x1xf32>
    %40 = math.rsqrt %39 : vector<64x1xf32>
    %41 = vector.broadcast %40 : vector<64x1xf32> to vector<64x32xf32>
    %42 = arith.mulf %37, %41 : vector<64x32xf32>
    %c0_21 = arith.constant 0 : index
    %c0_22 = arith.constant 0 : index
    %43 = vector.load %arg13[%c0_21, %c0_22] : memref<1x32xf32, #tpu.memory_space<vmem>>, vector<1x32xf32>
    %44 = vector.broadcast %43 : vector<1x32xf32> to vector<64x32xf32>
    %45 = arith.mulf %42, %44 : vector<64x32xf32>
    %c0_23 = arith.constant 0 : index
    %c0_24 = arith.constant 0 : index
    %46 = vector.load %arg14[%c0_23, %c0_24] : memref<1x32xf32, #tpu.memory_space<vmem>>, vector<1x32xf32>
    %47 = vector.broadcast %46 : vector<1x32xf32> to vector<64x32xf32>
    %48 = arith.addf %45, %47 : vector<64x32xf32>
    %c0_25 = arith.constant 0 : index
    %c0_26 = arith.constant 0 : index
    %49 = vector.load %arg9[%c0_25, %c0_26] : memref<1x32xf32, #tpu.memory_space<vmem>>, vector<1x32xf32>
    %50 = vector.broadcast %49 : vector<1x32xf32> to vector<64x32xf32>
    %51 = arith.addf %12, %50 : vector<64x32xf32>
    %52 = arith.addf %51, %15 : vector<64x32xf32>
    %cst_27 = arith.constant 0.000000e+00 : f32
    %53 = vector.broadcast %cst_27 : f32 to vector<64x32xf32>
    %54 = arith.cmpf oge, %52, %53 : vector<64x32xf32>
    %cst_28 = arith.constant 2.000000e-01 : f32
    %55 = vector.broadcast %cst_28 : f32 to vector<64x32xf32>
    %56 = arith.mulf %55, %52 : vector<64x32xf32>
    %57 = arith.select %54, %52, %56 : vector<64x32xi1>, vector<64x32xf32>
    %cst_29 = arith.constant dense<0.000000e+00> : vector<64xf32>
    %58 = vector.multi_reduction <add>, %57, %cst_29 [1] : vector<64x32xf32> to vector<64xf32>
    %59 = vector.shape_cast %58 : vector<64xf32> to vector<64x1xf32>
    %cst_30 = arith.constant 3.200000e+01 : f32
    %60 = vector.broadcast %cst_30 : f32 to vector<64x1xf32>
    %61 = arith.divf %59, %60 : vector<64x1xf32>
    %62 = vector.broadcast %61 : vector<64x1xf32> to vector<64x32xf32>
    %63 = arith.subf %57, %62 : vector<64x32xf32>
    %64 = arith.mulf %63, %63 : vector<64x32xf32>
    %cst_31 = arith.constant dense<0.000000e+00> : vector<64xf32>
    %65 = vector.multi_reduction <add>, %64, %cst_31 [1] : vector<64x32xf32> to vector<64xf32>
    %66 = vector.shape_cast %65 : vector<64xf32> to vector<64x1xf32>
    %cst_32 = arith.constant 3.200000e+01 : f32
    %67 = vector.broadcast %cst_32 : f32 to vector<64x1xf32>
    %68 = arith.divf %66, %67 : vector<64x1xf32>
    %69 = vector.broadcast %61 : vector<64x1xf32> to vector<64x32xf32>
    %70 = arith.subf %57, %69 : vector<64x32xf32>
    %cst_33 = arith.constant 9.99999974E-6 : f32
    %71 = vector.broadcast %cst_33 : f32 to vector<64x1xf32>
    %72 = arith.addf %68, %71 : vector<64x1xf32>
    %73 = math.rsqrt %72 : vector<64x1xf32>
    %74 = vector.broadcast %73 : vector<64x1xf32> to vector<64x32xf32>
    %75 = arith.mulf %70, %74 : vector<64x32xf32>
    %c0_34 = arith.constant 0 : index
    %c0_35 = arith.constant 0 : index
    %76 = vector.load %arg15[%c0_34, %c0_35] : memref<1x32xf32, #tpu.memory_space<vmem>>, vector<1x32xf32>
    %77 = vector.broadcast %76 : vector<1x32xf32> to vector<64x32xf32>
    %78 = arith.mulf %75, %77 : vector<64x32xf32>
    %c0_36 = arith.constant 0 : index
    %c0_37 = arith.constant 0 : index
    %79 = vector.load %arg16[%c0_36, %c0_37] : memref<1x32xf32, #tpu.memory_space<vmem>>, vector<1x32xf32>
    %80 = vector.broadcast %79 : vector<1x32xf32> to vector<64x32xf32>
    %81 = arith.addf %78, %80 : vector<64x32xf32>
    %c0_38 = arith.constant 0 : index
    %c0_39 = arith.constant 0 : index
    %82 = vector.load %arg5[%c0_38, %c0_39] : memref<256x32xf32, #tpu.memory_space<vmem>>, vector<256x32xf32>
    %cst_40 = arith.constant dense<0.000000e+00> : vector<64x256xf32>
    %83 = tpu.matmul %13, %82, %cst_40 {dimension_numbers = #tpu.dot_dimension_numbers<[1], [1], [0], [0], [0, 0, 1, 0], [], []>} : vector<64x32xf32>, vector<256x32xf32>, vector<64x256xf32> -> vector<64x256xf32>
    %c0_41 = arith.constant 0 : index
    %c0_42 = arith.constant 0 : index
    %84 = vector.load %arg4[%c0_41, %c0_42] : memref<64x64xi8, #tpu.memory_space<vmem>>, vector<64x64xi8>
    %85 = tpu.concatenate %84, %84, %84, %84 in 1 : vector<64x64xi8>, vector<64x64xi8>, vector<64x64xi8>, vector<64x64xi8> -> vector<64x256xi8>
    %c0_i8 = arith.constant 0 : i8
    %86 = vector.broadcast %c0_i8 : i8 to vector<64x256xi8>
    %87 = arith.cmpi ne, %85, %86 : vector<64x256xi8>
    %cst_43 = arith.constant 0.353553385 : f32
    %88 = vector.broadcast %cst_43 : f32 to vector<64x256xf32>
    %89 = arith.mulf %83, %88 : vector<64x256xf32>
    %cst_44 = arith.constant -1.000000e+30 : f32
    %90 = vector.broadcast %cst_44 : f32 to vector<64x256xf32>
    %91 = arith.select %87, %89, %90 : vector<64x256xi1>, vector<64x256xf32>
    %cst_45 = arith.constant dense<0xFF800000> : vector<64xf32>
    %92 = vector.multi_reduction <maximumf>, %91, %cst_45 [1] : vector<64x256xf32> to vector<64xf32>
    %93 = vector.shape_cast %92 : vector<64xf32> to vector<64x1xf32>
    %94 = vector.broadcast %93 : vector<64x1xf32> to vector<64x256xf32>
    %95 = arith.subf %91, %94 : vector<64x256xf32>
    %96 = math.exp %95 : vector<64x256xf32>
    %c0_46 = arith.constant 0 : index
    %c0_47 = arith.constant 0 : index
    %97 = vector.load %arg5[%c0_46, %c0_47] : memref<256x32xf32, #tpu.memory_space<vmem>>, vector<256x32xf32>
    %cst_48 = arith.constant dense<0.000000e+00> : vector<64x32xf32>
    %98 = tpu.matmul %96, %97, %cst_48 {dimension_numbers = #tpu.dot_dimension_numbers<[1], [0], [0], [1], [0, 0, 1, 1], [], []>} : vector<64x256xf32>, vector<256x32xf32>, vector<64x32xf32> -> vector<64x32xf32>
    %c0_49 = arith.constant 0 : index
    %c0_50 = arith.constant 0 : index
    %99 = vector.load %arg11[%c0_49, %c0_50] : memref<256x4xf32, #tpu.memory_space<vmem>>, vector<256x4xf32>
    %cst_51 = arith.constant dense<0.000000e+00> : vector<64x4xf32>
    %100 = tpu.matmul %96, %99, %cst_51 {dimension_numbers = #tpu.dot_dimension_numbers<[1], [0], [0], [1], [0, 0, 1, 1], [], []>} : vector<64x256xf32>, vector<256x4xf32>, vector<64x4xf32> -> vector<64x4xf32>
    %cst_52 = arith.constant 1.000000e-30 : f32
    %101 = vector.broadcast %cst_52 : f32 to vector<64x4xf32>
    %102 = arith.maximumf %100, %101 : vector<64x4xf32>
    %c0_53 = arith.constant 0 : index
    %c0_54 = arith.constant 0 : index
    %103 = vector.load %arg12[%c0_53, %c0_54] : memref<4x32xf32, #tpu.memory_space<vmem>>, vector<4x32xf32>
    %cst_55 = arith.constant dense<0.000000e+00> : vector<64x32xf32>
    %104 = tpu.matmul %102, %103, %cst_55 {dimension_numbers = #tpu.dot_dimension_numbers<[1], [0], [0], [1], [0, 0, 1, 1], [], []>} : vector<64x4xf32>, vector<4x32xf32>, vector<64x32xf32> -> vector<64x32xf32>
    %105 = arith.divf %98, %104 : vector<64x32xf32>
    %106 = arith.addf %1, %105 : vector<64x32xf32>
    %cst_56 = arith.constant 0.000000e+00 : f32
    %107 = vector.broadcast %cst_56 : f32 to vector<64x32xf32>
    %108 = arith.cmpf oge, %106, %107 : vector<64x32xf32>
    %cst_57 = arith.constant 2.000000e-01 : f32
    %109 = vector.broadcast %cst_57 : f32 to vector<64x32xf32>
    %110 = arith.mulf %109, %106 : vector<64x32xf32>
    %111 = arith.select %108, %106, %110 : vector<64x32xi1>, vector<64x32xf32>
    %cst_58 = arith.constant dense<0.000000e+00> : vector<64xf32>
    %112 = vector.multi_reduction <add>, %111, %cst_58 [1] : vector<64x32xf32> to vector<64xf32>
    %113 = vector.shape_cast %112 : vector<64xf32> to vector<64x1xf32>
    %cst_59 = arith.constant 3.200000e+01 : f32
    %114 = vector.broadcast %cst_59 : f32 to vector<64x1xf32>
    %115 = arith.divf %113, %114 : vector<64x1xf32>
    %116 = vector.broadcast %115 : vector<64x1xf32> to vector<64x32xf32>
    %117 = arith.subf %111, %116 : vector<64x32xf32>
    %118 = arith.mulf %117, %117 : vector<64x32xf32>
    %cst_60 = arith.constant dense<0.000000e+00> : vector<64xf32>
    %119 = vector.multi_reduction <add>, %118, %cst_60 [1] : vector<64x32xf32> to vector<64xf32>
    %120 = vector.shape_cast %119 : vector<64xf32> to vector<64x1xf32>
    %cst_61 = arith.constant 3.200000e+01 : f32
    %121 = vector.broadcast %cst_61 : f32 to vector<64x1xf32>
    %122 = arith.divf %120, %121 : vector<64x1xf32>
    %123 = vector.broadcast %115 : vector<64x1xf32> to vector<64x32xf32>
    %124 = arith.subf %111, %123 : vector<64x32xf32>
    %cst_62 = arith.constant 9.99999974E-6 : f32
    %125 = vector.broadcast %cst_62 : f32 to vector<64x1xf32>
    %126 = arith.addf %122, %125 : vector<64x1xf32>
    %127 = math.rsqrt %126 : vector<64x1xf32>
    %128 = vector.broadcast %127 : vector<64x1xf32> to vector<64x32xf32>
    %129 = arith.mulf %124, %128 : vector<64x32xf32>
    %c0_63 = arith.constant 0 : index
    %c0_64 = arith.constant 0 : index
    %130 = vector.load %arg17[%c0_63, %c0_64] : memref<1x32xf32, #tpu.memory_space<vmem>>, vector<1x32xf32>
    %131 = vector.broadcast %130 : vector<1x32xf32> to vector<64x32xf32>
    %132 = arith.mulf %129, %131 : vector<64x32xf32>
    %c0_65 = arith.constant 0 : index
    %c0_66 = arith.constant 0 : index
    %133 = vector.load %arg18[%c0_65, %c0_66] : memref<1x32xf32, #tpu.memory_space<vmem>>, vector<1x32xf32>
    %134 = vector.broadcast %133 : vector<1x32xf32> to vector<64x32xf32>
    %135 = arith.addf %132, %134 : vector<64x32xf32>
    %136 = arith.addf %135, %0 : vector<64x32xf32>
    %137 = arith.addf %48, %1 : vector<64x32xf32>
    %138 = arith.addf %81, %2 : vector<64x32xf32>
    %139 = tpu.concatenate %136, %137, %138 in 1 : vector<64x32xf32>, vector<64x32xf32>, vector<64x32xf32> -> vector<64x96xf32>
    %cst_67 = arith.constant 0.000000e+00 : f32
    %140 = vector.broadcast %cst_67 : f32 to vector<64x32xf32>
    %141 = tpu.concatenate %139, %140 in 1 : vector<64x96xf32>, vector<64x32xf32> -> vector<64x128xf32>
    %c0_68 = arith.constant 0 : index
    %c0_69 = arith.constant 0 : index
    %142 = vector.load %arg19[%c0_68, %c0_69] : memref<64x128xf32, #tpu.memory_space<vmem>>, vector<64x128xf32>
    tpu.vector_store %arg19[%c0_68, %c0_69], %141 {strides = array<i32>} : memref<64x128xf32, #tpu.memory_space<vmem>>, vector<64x128xf32>,
    return
  }
  func.func @transform_0(%arg0: i32) -> (i32, i32) {
    %c0_i32 = arith.constant 0 : i32
    %c0_i32_0 = arith.constant 0 : i32
    return %arg0, %c0_i32 : i32, i32
  }
  func.func @transform_1(%arg0: i32) -> (i32, i32) {
    %c0_i32 = arith.constant 0 : i32
    %c0_i32_0 = arith.constant 0 : i32
    return %arg0, %c0_i32 : i32, i32
  }
  func.func @transform_2(%arg0: i32) -> (i32, i32) {
    %c0_i32 = arith.constant 0 : i32
    %c0_i32_0 = arith.constant 0 : i32
    return %arg0, %c0_i32 : i32, i32
  }
  func.func @transform_3(%arg0: i32) -> (i32, i32) {
    %c0_i32 = arith.constant 0 : i32
    %c0_i32_0 = arith.constant 0 : i32
    return %arg0, %c0_i32 : i32, i32
  }
  func.func @transform_4(%arg0: i32) -> (i32, i32) {
    %c0_i32 = arith.constant 0 : i32
    %c0_i32_0 = arith.constant 0 : i32
    %c0_i32_1 = arith.constant 0 : i32
    return %c0_i32, %c0_i32_0 : i32, i32
  }
  func.func @transform_5(%arg0: i32) -> (i32, i32) {
    %c0_i32 = arith.constant 0 : i32
    %c0_i32_0 = arith.constant 0 : i32
    %c0_i32_1 = arith.constant 0 : i32
    return %c0_i32, %c0_i32_0 : i32, i32
  }
  func.func @transform_6(%arg0: i32) -> (i32, i32) {
    %c0_i32 = arith.constant 0 : i32
    %c0_i32_0 = arith.constant 0 : i32
    %c0_i32_1 = arith.constant 0 : i32
    return %c0_i32, %c0_i32_0 : i32, i32
  }
  func.func @transform_7(%arg0: i32) -> (i32, i32) {
    %c0_i32 = arith.constant 0 : i32
    %c0_i32_0 = arith.constant 0 : i32
    %c0_i32_1 = arith.constant 0 : i32
    return %c0_i32, %c0_i32_0 : i32, i32
  }
  func.func @transform_8(%arg0: i32) -> (i32, i32) {
    %c0_i32 = arith.constant 0 : i32
    %c0_i32_0 = arith.constant 0 : i32
    %c0_i32_1 = arith.constant 0 : i32
    return %c0_i32, %c0_i32_0 : i32, i32
  }
  func.func @transform_9(%arg0: i32) -> (i32, i32) {
    %c0_i32 = arith.constant 0 : i32
    %c0_i32_0 = arith.constant 0 : i32
    %c0_i32_1 = arith.constant 0 : i32
    return %c0_i32, %c0_i32_0 : i32, i32
  }
  func.func @transform_10(%arg0: i32) -> (i32, i32) {
    %c0_i32 = arith.constant 0 : i32
    %c0_i32_0 = arith.constant 0 : i32
    %c0_i32_1 = arith.constant 0 : i32
    return %c0_i32, %c0_i32_0 : i32, i32
  }
  func.func @transform_11(%arg0: i32) -> (i32, i32) {
    %c0_i32 = arith.constant 0 : i32
    %c0_i32_0 = arith.constant 0 : i32
    %c0_i32_1 = arith.constant 0 : i32
    return %c0_i32, %c0_i32_0 : i32, i32
  }
  func.func @transform_12(%arg0: i32) -> (i32, i32) {
    %c0_i32 = arith.constant 0 : i32
    %c0_i32_0 = arith.constant 0 : i32
    %c0_i32_1 = arith.constant 0 : i32
    return %c0_i32, %c0_i32_0 : i32, i32
  }
  func.func @transform_13(%arg0: i32) -> (i32, i32) {
    %c0_i32 = arith.constant 0 : i32
    %c0_i32_0 = arith.constant 0 : i32
    %c0_i32_1 = arith.constant 0 : i32
    return %c0_i32, %c0_i32_0 : i32, i32
  }
  func.func @transform_14(%arg0: i32) -> (i32, i32) {
    %c0_i32 = arith.constant 0 : i32
    %c0_i32_0 = arith.constant 0 : i32
    %c0_i32_1 = arith.constant 0 : i32
    return %c0_i32, %c0_i32_0 : i32, i32
  }
  func.func @transform_15(%arg0: i32) -> (i32, i32) {
    %c0_i32 = arith.constant 0 : i32
    %c0_i32_0 = arith.constant 0 : i32
    %c0_i32_1 = arith.constant 0 : i32
    return %c0_i32, %c0_i32_0 : i32, i32
  }
  func.func @transform_16(%arg0: i32) -> (i32, i32) {
    %c0_i32 = arith.constant 0 : i32
    %c0_i32_0 = arith.constant 0 : i32
    %c0_i32_1 = arith.constant 0 : i32
    return %c0_i32, %c0_i32_0 : i32, i32
  }
  func.func @transform_17(%arg0: i32) -> (i32, i32) {
    %c0_i32 = arith.constant 0 : i32
    %c0_i32_0 = arith.constant 0 : i32
    %c0_i32_1 = arith.constant 0 : i32
    return %c0_i32, %c0_i32_0 : i32, i32
  }
  func.func @transform_18(%arg0: i32) -> (i32, i32) {
    %c0_i32 = arith.constant 0 : i32
    %c0_i32_0 = arith.constant 0 : i32
    return %arg0, %c0_i32 : i32, i32
  }
}

</mosaic_0001>

<bundles_post_ra>
// kernel: tpu_custom_call.1
= control target key start
LH: loop header
LB: loop body
LE: loop exit
PB: predicated region body
PF: predicated region fallthrough
CT: control target
= control target key end

     0   :  { %s4117_s0 = inlined_call_operand.vmem [shape: f32[64,32], index: 0, kind: input, shape index: {}]   ;;  %s4118_s1 = inlined_call_operand.vmem [shape: f32[64,32], index: 1, kind: input, shape index: {}]   ;;  %s4119_s2 = inlined_call_operand.vmem [shape: f32[64,32], index: 2, kind: input, shape index: {}]   ;;  %s4120_s3 = inlined_call_operand.vmem [shape: s8[64,64], index: 3, kind: input, shape index: {}]   ;;  %s4121_s4 = inlined_call_operand.vmem [shape: f32[256,32], index: 4, kind: input, shape index: {}]   ;;  %s4122_s5 = inlined_call_operand.vmem [shape: f32[32,96], index: 5, kind: input, shape index: {}]   ;;  %s4123_s6 = inlined_call_operand.vmem [shape: f32[32,32], index: 6, kind: input, shape index: {}]   ;;  %s4124_s7 = inlined_call_operand.vmem [shape: f32[1,32], index: 7, kind: input, shape index: {}]   ;;  %s4125_s8 = inlined_call_operand.vmem [shape: f32[1,32], index: 8, kind: input, shape index: {}]   ;;  %s4126_s9 = inlined_call_operand.vmem [shape: f32[1,32], index: 9, kind: input, shape index: {}]   ;;  %s4127_s10 = inlined_call_operand.vmem [shape: f32[256,4], index: 10, kind: input, shape index: {}]   ;;  %s4128_s11 = inlined_call_operand.vmem [shape: f32[4,32], index: 11, kind: input, shape index: {}]   ;;  %s4129_s12 = inlined_call_operand.vmem [shape: f32[1,32], index: 12, kind: input, shape index: {}]   ;;  %s4130_s13 = inlined_call_operand.vmem [shape: f32[1,32], index: 13, kind: input, shape index: {}]   ;;  %s4131_s14 = inlined_call_operand.vmem [shape: f32[1,32], index: 14, kind: input, shape index: {}]   ;;  %s4132_s15 = inlined_call_operand.vmem [shape: f32[1,32], index: 15, kind: input, shape index: {}]   ;;  %s4133_s16 = inlined_call_operand.vmem [shape: f32[1,32], index: 16, kind: input, shape index: {}]   ;;  %s4134_s17 = inlined_call_operand.vmem [shape: f32[1,32], index: 17, kind: input, shape index: {}]   ;;  %s4135_s18 = inlined_call_operand.hbm [shape: f32[64,128], index: 18, kind: output, shape index: {}]  }
   0x1   :  { %4139 = sst [smem:[#allocation5_spill]] %s4117_s0 }
   0x2   :  { %4140 = sst [smem:[#allocation6_spill]] %s4118_s1 }
   0x3   :  { %4141 = sst [smem:[#allocation7_spill]] %s4119_s2 }
   0x4   :  { %v86_v0 = vld [vmem:[%s4122_s5] sm:$0xff]  ;;  %v87_v1 = vld [vmem:[%s4122_s5 + $0x8] sm:$0xff]  ;;  %vm90_vm0 = vcmask 261120   ;;  %v88_v5 = vld [vmem:[%s4122_s5 + $0x10] sm:$0xff]  ;;  %s4142_s30 = sld [smem:[#allocation5_spill]]  ;;  %s4143_s19 = sld [smem:[#allocation6_spill]] }
   0x5   :  { %v220_v2 = vld [vmem:[%s4123_s6] sm:$0xff]  ;;  %v2442_v3 = vpack.c.bf16 %v87_v1, %v86_v0  ;;  %v221_v4 = vld [vmem:[%s4123_s6 + $0x8] sm:$0xff]  ;;  %v89_v6 = vld [vmem:[%s4122_s5 + $0x18] sm:$0xff] }
   0x6   :  { %v2450_v7 = vpack.c.bf16 %v221_v4, %v220_v2  ;;  %v2446_v8 = vpack.c.bf16 %v89_v6, %v88_v5  ;;  %v222_v9 = vld [vmem:[%s4123_s6 + $0x10] sm:$0xff]  ;;  %v223_v10 = vld [vmem:[%s4123_s6 + $0x18] sm:$0xff] }
   0x7   :  { %2443 = vmatprep.subr.bf16.mxu0 %v2442_v3  ;;  %v2454_v12 = vpack.c.bf16 %v223_v10, %v222_v9 }
   0x8   :  { %2451 = vmatprep.subr.bf16.mxu1 %v2450_v7  ;;  %2445 = vmatpush3.bf16.msra.mxu0 %v2442_v3 }
   0x9   :  { %2453 = vmatpush3.bf16.msra.mxu1 %v2450_v7  ;;  %2447 = vmatprep.subr.bf16.mxu0 %v2446_v8 }
   0xa   :  { %v62_v11 = vld [vmem:[%s4142_s30] sm:$0xff]  ;;  %2455 = vmatprep.subr.bf16.mxu1 %v2454_v12  ;;  %v63_v14 = vld [vmem:[%s4142_s30 + $0x8] sm:$0xff] }
   0xb   :  { %2384 = vmatprep.mubr.msk.f32.mxu0 %vm90_vm0, %v62_v11  ;;  %v70_v13 = vld [vmem:[%s4143_s19] sm:$0xff] }
   0xc   :  { %2404 = vmatprep.mubr.msk.f32.mxu1 %vm90_vm0, %v70_v13  ;;  %2449 = vmatpush3.bf16.msra.mxu0 %v2446_v8 }
   0xd   :  { %23 = vsyncpa [#allocation3], 0  ;;  %2457 = vmatpush3.bf16.msra.mxu1 %v2454_v12  ;;  %v71_v15 = vld [vmem:[%s4143_s19 + $0x8] sm:$0xff]  ;;  %v64_v16 = vld [vmem:[%s4142_s30 + $0x10] sm:$0xff]  ;;  %s2723_s2 = smov 64   ;;  %s4146_s23 = sld [smem:[#allocation7_spill]] }
   0xe   :  { %v72_v17 = vld [vmem:[%s4143_s19 + $0x10] sm:$0xff]  ;;  %v65_v18 = vld [vmem:[%s4142_s30 + $0x18] sm:$0xff]  ;;  %v66_v20 = vld [vmem:[%s4142_s30 + $0x20] sm:$0xff]  ;;  %vm1176_vm2 = vcmask 523264   ;;  %s2725_s0 = smov 32   ;;  %s2726_s6 = smov 96  }
   0xf   :  { %2385 = vmatmul.mubr.msk.f32.vlgmr.msra.gmra.mrb[0].mxu0 %vm90_vm0, %v63_v14  ;;  %v73_v19 = vld [vmem:[%s4143_s19 + $0x18] sm:$0xff]  ;;  %v74_v21 = vld [vmem:[%s4143_s19 + $0x20] sm:$0xff]  ;;  %v67_v22 = vld [vmem:[%s4142_s30 + $0x28] sm:$0xff]  ;;  %s2727_s25 = smov [#allocation2]  }
  0x10   :  { %2405 = vmatmul.mubr.msk.f32.vlgmr.msra.gmra.mrb[0].mxu1 %vm90_vm0, %v71_v15  ;;  %2387 = vmatprep.mubr.msk.f32.mxu0 %vm90_vm0, %v64_v16  ;;  %v75_v23 = vld [vmem:[%s4143_s19 + $0x28] sm:$0xff]  ;;  %v68_v24 = vld [vmem:[%s4142_s30 + $0x30] sm:$0xff]  ;;  %v69_v26 = vld [vmem:[%s4142_s30 + $0x38] sm:$0xff]  ;;  %s2082_s26 = sshll.u32 %s2727_s25, 4  ;;  %s2083_s26 = int_to_ptr.vmem [resolvable:$true] %s2082_s26 }
  0x11   :  { %2407 = vmatprep.mubr.msk.f32.mxu1 %vm90_vm0, %v72_v17  ;;  %v76_v25 = vld [vmem:[%s4143_s19 + $0x30] sm:$0xff]  ;;  %v77_v27 = vld [vmem:[%s4143_s19 + $0x38] sm:$0xff]  ;;  %v905_v28 = vld [vmem:[%s4121_s4 + $0x80] sm:$0xff]  ;;  %p2704_p1 = scmp.lt.s32.totalorder %s2083_s26, %s2083_s26 }
  0x12   :  { %v906_v29 = vld [vmem:[%s4121_s4 + $0x88] sm:$0xff]  ;;  %vm2921_vm1 = vmpackc.low %vm90_vm0, %vm90_vm0  ;;  %v889_v32 = vld [vmem:[%s4121_s4] sm:$0xff] }
  0x13   :  { %2388 = vmatmul.mubr.msk.f32.gmra.mrb[2].mxu0 %vm90_vm0, %v65_v18  ;;  %v2458_v31 = vpack.c.bf16 %v906_v29, %v905_v28  ;;  %v890_v33 = vld [vmem:[%s4121_s4 + $0x8] sm:$0xff]  ;;  %v907_v34 = vld [vmem:[%s4121_s4 + $0x90] sm:$0xff]  ;;  %v908_v36 = vld [vmem:[%s4121_s4 + $0x98] sm:$0xff] }
  0x14   :  { %2408 = vmatmul.mubr.msk.f32.gmra.mrb[2].mxu1 %vm90_vm0, %v73_v19  ;;  %2390 = vmatprep.mubr.msk.f32.mxu0 %vm90_vm0, %v66_v20  ;;  %v2461_v35 = vpack.c.bf16 %v890_v33, %v889_v32  ;;  %v2464_v37 = vpack.c.bf16 %v908_v36, %v907_v34  ;;  %v891_v38 = vld [vmem:[%s4121_s4 + $0x10] sm:$0xff]  ;;  %v892_v39 = vld [vmem:[%s4121_s4 + $0x18] sm:$0xff]  ;;  %v909_v40 = vld [vmem:[%s4121_s4 + $0xa0] sm:$0xff] }
  0x15   :  { %2410 = vmatprep.mubr.msk.f32.mxu1 %vm90_vm0, %v74_v21  ;;  %2460 = vmatprep.subr.msk.bf16.mxu0 %vm2921_vm1, %v2458_v31  ;;  %v910_v41 = vld [vmem:[%s4121_s4 + $0xa8] sm:$0xff]  ;;  %v2467_v42 = vpack.c.bf16 %v892_v39, %v891_v38  ;;  %v893_v44 = vld [vmem:[%s4121_s4 + $0x20] sm:$0xff]  ;;  %v911_v46 = vld [vmem:[%s4121_s4 + $0xb0] sm:$0xff] }
  0x16   :  { %2507 = vmatprep.subr.bf16.mxu1 %v2458_v31  ;;  %2463 = vmatpush3.bf16.xpose.msk.msra.mxu0 %vm2921_vm1, %v2461_v35  ;;  %v2470_v43 = vpack.c.bf16 %v910_v41, %v909_v40  ;;  %v894_v45 = vld [vmem:[%s4121_s4 + $0x28] sm:$0xff]  ;;  %v912_v47 = vld [vmem:[%s4121_s4 + $0xb8] sm:$0xff]  ;;  %v895_v50 = vld [vmem:[%s4121_s4 + $0x30] sm:$0xff] }
  0x17   :  { %2391 = vmatmul.mubr.msk.f32.gmra.mrb[4].mxu0 %vm90_vm0, %v67_v22  ;;  %2509 = vmatpush3.bf16.msra.mxu1 %v2461_v35  ;;  %v2473_v48 = vpack.c.bf16 %v894_v45, %v893_v44  ;;  %v2476_v49 = vpack.c.bf16 %v912_v47, %v911_v46  ;;  %v896_v51 = vld [vmem:[%s4121_s4 + $0x38] sm:$0xff]  ;;  %v913_v52 = vld [vmem:[%s4121_s4 + $0xc0] sm:$0xff]  ;;  %v914_v53 = vld [vmem:[%s4121_s4 + $0xc8] sm:$0xff] }
  0x18   :  { %2411 = vmatmul.mubr.msk.f32.gmra.mrb[4].mxu1 %vm90_vm0, %v75_v23  ;;  %2393 = vmatprep.mubr.msk.f32.mxu0 %vm90_vm0, %v68_v24  ;;  %v2479_v54 = vpack.c.bf16 %v896_v51, %v895_v50  ;;  %v2482_v55 = vpack.c.bf16 %v914_v53, %v913_v52  ;;  %v897_v56 = vld [vmem:[%s4121_s4 + $0x40] sm:$0xff]  ;;  %v898_v57 = vld [vmem:[%s4121_s4 + $0x48] sm:$0xff]  ;;  %v915_v58 = vld [vmem:[%s4121_s4 + $0xd0] sm:$0xff] }
  0x19   :  { %2413 = vmatprep.mubr.msk.f32.mxu1 %vm90_vm0, %v76_v25  ;;  %2466 = vmatprep.subr.msk.bf16.mxu0 %vm2921_vm1, %v2464_v37  ;;  %v916_v59 = vld [vmem:[%s4121_s4 + $0xd8] sm:$0xff]  ;;  %v2485_v60 = vpack.c.bf16 %v898_v57, %v897_v56  ;;  %v899_v62 = vld [vmem:[%s4121_s4 + $0x50] sm:$0xff]  ;;  %v917_v0 = vld [vmem:[%s4121_s4 + $0xe0] sm:$0xff] }
  0x1a   :  { %2511 = vmatprep.subr.bf16.mxu1 %v2464_v37  ;;  %v2488_v61 = vpack.c.bf16 %v916_v59, %v915_v58  ;;  %v900_v63 = vld [vmem:[%s4121_s4 + $0x58] sm:$0xff]  ;;  %v918_v1 = vld [vmem:[%s4121_s4 + $0xe8] sm:$0xff]  ;;  %v901_v4 = vld [vmem:[%s4121_s4 + $0x60] sm:$0xff] }
  0x1b   :  { %2394 = vmatmul.mubr.msk.f32.gmra.mrb[6].mxu0 %vm90_vm0, %v69_v26  ;;  %2513 = vmatpush3.bf16.msra.mxu1 %v2467_v42  ;;  %v2491_v2 = vpack.c.bf16 %v900_v63, %v899_v62  ;;  %v2494_v3 = vpack.c.bf16 %v918_v1, %v917_v0  ;;  %v902_v5 = vld [vmem:[%s4121_s4 + $0x68] sm:$0xff]  ;;  %v919_v6 = vld [vmem:[%s4121_s4 + $0xf0] sm:$0xff]  ;;  %v920_v7 = vld [vmem:[%s4121_s4 + $0xf8] sm:$0xff] }
  0x1c   :  { %2414 = vmatmul.mubr.msk.f32.gmra.mrb[6].mxu1 %vm90_vm0, %v77_v27  ;;  %2515 = vmatprep.subr.bf16.mxu1 %v2470_v43  ;;  %v2497_v8 = vpack.c.bf16 %v902_v5, %v901_v4  ;;  %v2500_v9 = vpack.c.bf16 %v920_v7, %v919_v6  ;;  %v903_v10 = vld [vmem:[%s4121_s4 + $0x70] sm:$0xff]  ;;  %v904_v11 = vld [vmem:[%s4121_s4 + $0x78] sm:$0xff]  ;;  %v2118_v13 = vld [vmem:[%s4124_s7] ss:$0 sm:$0xff] }
  0x1d   :  { %v2503_v12 = vpack.c.bf16 %v904_v11, %v903_v10  ;;  %v3053_v14 = vld [vmem:[%s4126_s9] ss:$0 sm:$0xff]  ;;  %v79_v56 = vld [vmem:[%s4146_s23 + $0x8] sm:$0xff]  ;;  %v80_v57 = vld [vmem:[%s4146_s23 + $0x10] sm:$0xff] }
  0x1e   :  { %2469 = vmatpush3.bf16.xpose.msk.msra.mxu0 %vm2921_vm1, %v2467_v42  ;;  %v1170_v58 = vld [vmem:[%s4120_s3] sm:$0xff]  ;;  %v81_v59 = vld [vmem:[%s4146_s23 + $0x18] sm:$0xff]  ;;  %v83_v62 = vld [vmem:[%s4146_s23 + $0x28] sm:$0xff] }
  0x1f   :  { %2517 = vmatpush3.bf16.msra.mxu1 %v2473_v48  ;;  %2472 = vmatprep.subr.msk.bf16.mxu0 %vm2921_vm1, %v2470_v43  ;;  %v84_v63 = vld [vmem:[%s4146_s23 + $0x30] sm:$0xff]  ;;  %v85_v0 = vld [vmem:[%s4146_s23 + $0x38] sm:$0xff] }
  0x20   :  { %2519 = vmatprep.subr.bf16.mxu1 %v2476_v49 }
  0x23   :  { %2521 = vmatpush3.bf16.msra.mxu1 %v2479_v54 }
  0x24   :  { %2523 = vmatprep.subr.bf16.mxu1 %v2482_v55 }
  0x26   :  { %2475 = vmatpush3.bf16.xpose.msk.msra.mxu0 %vm2921_vm1, %v2473_v48 }
  0x27   :  { %2525 = vmatpush3.bf16.msra.mxu1 %v2485_v60  ;;  %2478 = vmatprep.subr.msk.bf16.mxu0 %vm2921_vm1, %v2476_v49 }
  0x28   :  { %2527 = vmatprep.subr.bf16.mxu1 %v2488_v61 }
  0x2b   :  { %2529 = vmatpush3.bf16.msra.mxu1 %v2491_v2 }
  0x2c   :  { %2531 = vmatprep.subr.bf16.mxu1 %v2494_v3 }
  0x2e   :  { %2481 = vmatpush3.bf16.xpose.msk.msra.mxu0 %vm2921_vm1, %v2479_v54 }
  0x2f   :  { %2533 = vmatpush3.bf16.msra.mxu1 %v2497_v8  ;;  %2484 = vmatprep.subr.msk.bf16.mxu0 %vm2921_vm1, %v2482_v55  ;;  %v78_v55 = vld [vmem:[%s4146_s23] sm:$0xff] }
  0x30   :  { %2535 = vmatprep.subr.bf16.mxu1 %v2500_v9  ;;  %2416 = vmatprep.mubr.msk.f32.mxu1 %vm90_vm0, %v78_v55 }
  0x31   :  { %2417 = vmatmul.mubr.msk.f32.gmra.mrb[8].mxu1 %vm90_vm0, %v79_v56 }
  0x32   :  { %2419 = vmatprep.mubr.msk.f32.mxu1 %vm90_vm0, %v80_v57 }
  0x33   :  { %2537 = vmatpush3.bf16.msra.mxu1 %v2503_v12 }
  0x35   :  { %2420 = vmatmul.mubr.msk.f32.gmra.mrb[10].mxu1 %vm90_vm0, %v81_v59 }
  0x36   :  { %2487 = vmatpush3.bf16.xpose.msk.msra.mxu0 %vm2921_vm1, %v2485_v60  ;;  %v1171_v60 = vld [vmem:[%s4120_s3 + $0x8] sm:$0xff] }
  0x37   :  { %2490 = vmatprep.subr.msk.bf16.mxu0 %vm2921_vm1, %v2488_v61  ;;  %v82_v61 = vld [vmem:[%s4146_s23 + $0x20] sm:$0xff] }
  0x38   :  { %2422 = vmatprep.mubr.msk.f32.mxu1 %vm90_vm0, %v82_v61 }
  0x39   :  { %2423 = vmatmul.mubr.msk.f32.gmra.mrb[12].mxu1 %vm90_vm0, %v83_v62 }
  0x3a   :  { %2425 = vmatprep.mubr.msk.f32.mxu1 %vm90_vm0, %v84_v63 }
  0x3d   :  { %2426 = vmatmul.mubr.msk.f32.gmra.mrb[14].mxu1 %vm90_vm0, %v85_v0 }
  0x3e   :  { %2493 = vmatpush3.bf16.xpose.msk.msra.mxu0 %vm2921_vm1, %v2491_v2 }
  0x3f   :  { %2496 = vmatprep.subr.msk.bf16.mxu0 %vm2921_vm1, %v2494_v3 }
  0x46   :  { %2499 = vmatpush3.bf16.xpose.msk.msra.mxu0 %vm2921_vm1, %v2497_v8 }
  0x47   :  { %2502 = vmatprep.subr.msk.bf16.mxu0 %vm2921_vm1, %v2500_v9 }
  0x4e   :  { %2505 = vmatpush3.bf16.xpose.msk.msra.mxu0 %vm2921_vm1, %v2503_v12 }
  0xe2   :  { %v3055_v15 = vpop.f32.mrb[0].mxu0 }
  0xe3   :  { %v432_v16 = vadd.f32 %v3055_v15, %v2118_v13  ;;  %v2406_v17 = vpop.f32.mrb[0].mxu1  ;;  %v3058_v18 = vpop.f32.mrb[1].mxu0 }
  0xe4   :  { %v351_v19 = vadd.f32 %v2406_v17, %v3053_v14  ;;  %v431_v20 = vadd.f32 %v2118_v13, %v3058_v18  ;;  %v345_v21 = vpop.f32.mrb[1].mxu1  ;;  %929 = vrot.lane.b32.xlu0 %v3058_v18, %s2723_s2 }
  0xe5   :  { %v346_v22 = vadd.f32 %v3053_v14, %v345_v21 }
  0xe6   :  { %v3065_v23 = vadd.f32 %v432_v16, %v351_v19  ;;  %v3067_v24 = vpop.f32.mrb[2].mxu0 }
  0xe7   :  { %v3069_v25 = vadd.f32 %v431_v20, %v346_v22  ;;  %v434_v26 = vadd.f32 %v3067_v24, %v2118_v13  ;;  %v3072_v27 = vpop.f32.mrb[3].mxu0  ;;  %v2409_v28 = vpop.f32.mrb[2].mxu1  ;;  %v2724_v22 = vmov 0  }
  0xe8   :  { %v433_v29 = vadd.f32 %v2118_v13, %v3072_v27  ;;  %v361_v30 = vadd.f32 %v2409_v28, %v3053_v14  ;;  %v355_v31 = vpop.f32.mrb[3].mxu1  ;;  %931 = vrot.lane.b32.xlu0 %v3055_v15, %s2723_s2  ;;  %933 = vrot.lane.b32.xlu1 %v3072_v27, %s2723_s2 }
  0xe9   :  { %v356_v32 = vadd.f32 %v3053_v14, %v355_v31 }
  0xea   :  { %v3081_v33 = vadd.f32 %v434_v26, %v361_v30  ;;  %v3083_v34 = vpop.f32.mrb[4].mxu0 }
  0xeb   :  { %v3085_v35 = vadd.f32 %v433_v29, %v356_v32  ;;  %v436_v36 = vadd.f32 %v3083_v34, %v2118_v13  ;;  %v2412_v37 = vpop.f32.mrb[4].mxu1  ;;  %v3088_v38 = vpop.f32.mrb[5].mxu0 }
  0xec   :  { %935 = vrot.lane.b32.xlu1 %v3067_v24, %s2723_s2  ;;  %v371_v39 = vadd.f32 %v2412_v37, %v3053_v14  ;;  %v435_v40 = vadd.f32 %v2118_v13, %v3088_v38  ;;  %v365_v41 = vpop.f32.mrb[5].mxu1  ;;  %937 = vrot.lane.b32.xlu0 %v3088_v38, %s2723_s2 }
  0xed   :  { %v366_v42 = vadd.f32 %v3053_v14, %v365_v41 }
  0xee   :  { %v3097_v43 = vadd.f32 %v436_v36, %v371_v39  ;;  %v3099_v44 = vpop.f32.mrb[6].mxu0 }
  0xef   :  { %v3101_v45 = vadd.f32 %v435_v40, %v366_v42  ;;  %v438_v46 = vadd.f32 %v3099_v44, %v2118_v13  ;;  %v2415_v47 = vpop.f32.mrb[6].mxu1  ;;  %v3104_v48 = vpop.f32.mrb[7].mxu0 }
  0xf0   :  { %939 = vrot.lane.b32.xlu1 %v3083_v34, %s2723_s2  ;;  %v381_v49 = vadd.f32 %v2415_v47, %v3053_v14  ;;  %v437_v50 = vadd.f32 %v2118_v13, %v3104_v48  ;;  %v375_v51 = vpop.f32.mrb[7].mxu1  ;;  %941 = vrot.lane.b32.xlu0 %v3104_v48, %s2723_s2 }
  0xf1   :  { %v376_v52 = vadd.f32 %v3053_v14, %v375_v51 }
  0xf2   :  { %v3113_v53 = vadd.f32 %v438_v46, %v381_v49 }
  0xf3   :  { %v3115_v54 = vadd.f32 %v437_v50, %v376_v52 }
  0xf4   :  { %943 = vrot.lane.b32.xlu1 %v3099_v44, %s2723_s2  ;;  %1172 = vrot.lane.b32.xlu0 %v1170_v58, %s2723_s2 }
  0xf8   :  { %1174 = vrot.lane.b32.xlu1 %v1171_v60, %s2723_s2 }
 0x104   :  { %v3175_v9 = vpop.f32.mrb[8].mxu1 }
 0x105   :  { %v3177_v10 = vpop.f32.mrb[9].mxu1 }
 0x108   :  { %v3179_v11 = vpop.f32.mrb[10].mxu1 }
 0x109   :  { %v3181_v12 = vpop.f32.mrb[11].mxu1 }
 0x10c   :  { %v3183_v13 = vpop.f32.mrb[12].mxu1 }
 0x10d   :  { %v3185_v16 = vpop.f32.mrb[13].mxu1 }
 0x110   :  { %v3187_v17 = vpop.f32.mrb[14].mxu1 }
 0x111   :  { %v3189_v19 = vpop.f32.mrb[15].mxu1 }
 0x156   :  { %v930_v1 = vpop.permute.xlu0 %929 }
 0x157   :  { %2239 = vmatprep.mubr.msk.f32.mxu0 %vm90_vm0, %v930_v1 }
 0x158   :  { %2240 = vmatmul.mubr.msk.f32.vlgmr.msra.gmra.mrb[8].mxu0 %vm90_vm0, %v930_v1 }
 0x15a   :  { %v932_v2 = vpop.permute.xlu0 %931  ;;  %v934_v3 = vpop.permute.xlu1 %933 }
 0x15b   :  { %2241 = vmatprep.mubr.msk.f32.mxu0 %vm90_vm0, %v932_v2 }
 0x15c   :  { %2242 = vmatmul.mubr.msk.f32.gmra.mrb[10].mxu0 %vm90_vm0, %v932_v2 }
 0x15d   :  { %2243 = vmatprep.mubr.msk.f32.mxu0 %vm90_vm0, %v934_v3 }
 0x15e   :  { %v936_v4 = vpop.permute.xlu1 %935  ;;  %v938_v5 = vpop.permute.xlu0 %937 }
 0x160   :  { %2244 = vmatmul.mubr.msk.f32.gmra.mrb[12].mxu0 %vm90_vm0, %v934_v3 }
 0x161   :  { %2245 = vmatprep.mubr.msk.f32.mxu0 %vm90_vm0, %v936_v4 }
 0x162   :  { %v940_v6 = vpop.permute.xlu1 %939  ;;  %v942_v7 = vpop.permute.xlu0 %941 }
 0x164   :  { %2246 = vmatmul.mubr.msk.f32.gmra.mrb[14].mxu0 %vm90_vm0, %v936_v4 }
 0x165   :  { %2247 = vmatprep.mubr.msk.f32.mxu0 %vm90_vm0, %v938_v5 }
 0x166   :  { %v944_v8 = vpop.permute.xlu1 %943  ;;  %v1173_v20 = vpop.permute.xlu0 %1172 }
 0x167   :  { %v1179_v21 = vsel %vm1176_vm2, %v1170_v58, %v1173_v20 }
 0x168   :  { %2248 = vmatmul.mubr.msk.f32.gmra.mrb[16].mxu0 %vm90_vm0, %v938_v5  ;;  %vm1185_vm3 = vnez %v1179_v21 }
 0x169   :  { %2249 = vmatprep.mubr.msk.f32.mxu0 %vm90_vm0, %v940_v6  ;;  %v1203_v26 = vsel %vm1185_vm3, 16843009, %v2724_v22 }
 0x16a   :  { %v1205_v28 = vunpack.c.0.s8 %v1203_v26  ;;  %v1206_v29 = vunpack.c.1.s8 %v1203_v26  ;;  %v1175_v30 = vpop.permute.xlu1 %1174  ;;  %v1207_v36 = vunpack.c.2.s8 %v1203_v26  ;;  %v1208_v40 = vunpack.c.3.s8 %v1203_v26 }
 0x16b   :  { %v1183_v32 = vsel %vm1176_vm2, %v1171_v60, %v1175_v30 }
 0x16c   :  { %2250 = vmatmul.mubr.msk.f32.gmra.mrb[18].mxu0 %vm90_vm0, %v940_v6  ;;  %v1213_v31 = vpack.c.b16 %v1205_v28, %v1205_v28  ;;  %v1215_v39 = vpack.c.b16 %v1206_v29, %v1206_v29  ;;  %vm1186_vm4 = vnez %v1183_v32  ;;  %v1217_v42 = vpack.c.b16 %v1207_v36, %v1207_v36 }
 0x16d   :  { %2251 = vmatprep.mubr.msk.f32.mxu0 %vm90_vm0, %v942_v7  ;;  %v1204_v46 = vsel %vm1186_vm4, 16843009, %v2724_v22  ;;  %v1219_v49 = vpack.c.b16 %v1208_v40, %v1208_v40 }
 0x16e   :  { %v1214_v37 = vpack.c.b8 %v1213_v31, %v1213_v31  ;;  %v1216_v41 = vpack.c.b8 %v1215_v39, %v1215_v39  ;;  %v1209_v50 = vunpack.c.0.s8 %v1204_v46  ;;  %v1218_v51 = vpack.c.b8 %v1217_v42, %v1217_v42 }
 0x16f   :  { %v1220_v57 = vpack.c.b8 %v1219_v49, %v1219_v49  ;;  %v1210_v58 = vunpack.c.1.s8 %v1204_v46  ;;  %v1211_v5 = vunpack.c.2.s8 %v1204_v46  ;;  %v1212_v36 = vunpack.c.3.s8 %v1204_v46 }
 0x170   :  { %2252 = vmatmul.mubr.msk.f32.gmra.mrb[20].mxu0 %vm90_vm0, %v942_v7  ;;  %vm1229_vm5 = vnez %v1214_v37  ;;  %vm1230_vm6 = vnez %v1216_v41  ;;  %vm1231_vm7 = vnez %v1218_v51  ;;  %v1221_v59 = vpack.c.b16 %v1209_v50, %v1209_v50 }
 0x171   :  { %2253 = vmatprep.mubr.msk.f32.mxu0 %vm90_vm0, %v944_v8  ;;  %v1237_v47 = vsel %vm1229_vm5, 16843009, %v2724_v22  ;;  %v1238_v56 = vsel %vm1230_vm6, 16843009, %v2724_v22  ;;  %v1239_v1 = vsel %vm1231_vm7, 16843009, %v2724_v22  ;;  %vm1232_vm10 = vnez %v1220_v57 }
 0x172   :  { %v1245_v52 = vunpack.c.0.s8 %v1237_v47  ;;  %v1246_v55 = vunpack.c.1.s8 %v1237_v47  ;;  %v1247_v61 = vunpack.c.0.s8 %v1238_v56  ;;  %v1248_v0 = vunpack.c.1.s8 %v1238_v56 }
 0x173   :  { %v1222_v3 = vpack.c.b8 %v1221_v59, %v1221_v59  ;;  %v1223_v4 = vpack.c.b16 %v1210_v58, %v1210_v58  ;;  %v1249_v20 = vunpack.c.0.s8 %v1239_v1  ;;  %v1240_v21 = vsel %vm1232_vm10, 16843009, %v2724_v22 }
 0x174   :  { %2254 = vmatmul.mubr.msk.f32.gmra.mrb[22].mxu0 %vm90_vm0, %v944_v8  ;;  %vm1261_vm8 = vcmp.ne.s32.totalorder %v1245_v52, 0  ;;  %vm1262_vm9 = vcmp.ne.s32.totalorder %v1246_v55, 0  ;;  %vm1263_vm11 = vcmp.ne.s32.totalorder %v1247_v61, 0  ;;  %vm1264_vm12 = vcmp.ne.s32.totalorder %v1248_v0, 0 }
 0x175   :  { %v1250_v30 = vunpack.c.1.s8 %v1239_v1  ;;  %vm1233_vm13 = vnez %v1222_v3  ;;  %v1224_v32 = vpack.c.b8 %v1223_v4, %v1223_v4  ;;  %v1251_v39 = vunpack.c.0.s8 %v1240_v21 }
 0x176   :  { %vm1265_vm14 = vcmp.ne.s32.totalorder %v1249_v20, 0  ;;  %v1252_v42 = vunpack.c.1.s8 %v1240_v21  ;;  %v1225_v47 = vpack.c.b16 %v1211_v5, %v1211_v5  ;;  %v1241_v52 = vsel %vm1233_vm13, 16843009, %v2724_v22 }
 0x177   :  { %vm1266_vm15 = vcmp.ne.s32.totalorder %v1250_v30, 0  ;;  %vm1234_vm1 = vnez %v1224_v32  ;;  %vm1267_vm3 = vcmp.ne.s32.totalorder %v1251_v39, 0  ;;  %v1227_v56 = vpack.c.b16 %v1212_v36, %v1212_v36 }
 0x178   :  { %vm1268_vm4 = vcmp.ne.s32.totalorder %v1252_v42, 0  ;;  %v1253_v59 = vunpack.c.0.s8 %v1241_v52  ;;  %v1254_v0 = vunpack.c.1.s8 %v1241_v52  ;;  %v1242_v1 = vsel %vm1234_vm1, 16843009, %v2724_v22 }
 0x179   :  { %v1228_v4 = vpack.c.b8 %v1227_v56, %v1227_v56  ;;  %v1255_v20 = vunpack.c.0.s8 %v1242_v1 }
 0x17a   :  { %vm1269_vm5 = vcmp.ne.s32.totalorder %v1253_v59, 0  ;;  %vm1270_vm7 = vcmp.ne.s32.totalorder %v1254_v0, 0 }
 0x22b   :  { %v1123_v60 = vpop.f32.mrb[8].mxu0 }
 0x22c   :  { %v1187_v62 = vmul.f32 0.35355338, %v1123_v60  ;;  %v1125_v63 = vpop.f32.mrb[9].mxu0  ;;  %v1226_v60 = vpack.c.b8 %v1225_v47, %v1225_v47 }
 0x22d   :  { %v1188_v2 = vmul.f32 0.35355338, %v1125_v63 }
 0x22e   :  { %v3198_v6 = vsel %vm1261_vm8, %v1187_v62, -1e+30  ;;  %vm1235_vm6 = vnez %v1226_v60  ;;  %vm1271_vm8 = vcmp.ne.s32.totalorder %v1255_v20, 0 }
 0x22f   :  { %v1129_v7 = vpop.f32.mrb[10].mxu0  ;;  %v3200_v8 = vsel %vm1262_vm9, %v1188_v2, -1e+30  ;;  %v1243_v32 = vsel %vm1235_vm6, 16843009, %v2724_v22  ;;  %vm1236_vm9 = vnez %v1228_v4 }
 0x230   :  { %v1189_v26 = vmul.f32 0.35355338, %v1129_v7  ;;  %v1131_v28 = vpop.f32.mrb[11].mxu0  ;;  %v1293_v29 = vmax.f32 %v3198_v6, %v3200_v8  ;;  %v1258_v52 = vunpack.c.1.s8 %v1243_v32 }
 0x231   :  { %v1190_v31 = vmul.f32 0.35355338, %v1131_v28 }
 0x232   :  { %1294 = vmax.xlane.f32.xlu0 %v1293_v29  ;;  %v3205_v37 = vsel %vm1263_vm11, %v1189_v26, -1e+30  ;;  %v1256_v29 = vunpack.c.1.s8 %v1242_v1 }
 0x233   :  { %v1135_v40 = vpop.f32.mrb[12].mxu0  ;;  %v3207_v41 = vsel %vm1264_vm12, %v1190_v31, -1e+30  ;;  %vm1274_vm12 = vcmp.ne.s32.totalorder %v1258_v52, 0  ;;  %v401_v52 = vadd.f32 %v3179_v11, %v3053_v14 }
 0x234   :  { %v1191_v49 = vmul.f32 0.35355338, %v1135_v40  ;;  %v1137_v50 = vpop.f32.mrb[13].mxu0  ;;  %v1296_v51 = vmax.f32 %v3205_v37, %v3207_v41  ;;  %vm1272_vm10 = vcmp.ne.s32.totalorder %v1256_v29, 0 }
 0x235   :  { %v1192_v55 = vmul.f32 0.35355338, %v1137_v50  ;;  %v1257_v50 = vunpack.c.0.s8 %v1243_v32  ;;  %v1487_v32 = vld [vmem:[%s4127_s10 + $0x88] sm:$0xff] }
 0x236   :  { %1297 = vmax.xlane.f32.xlu1 %v1296_v51  ;;  %v3212_v46 = vsel %vm1265_vm14, %v1191_v49, -1e+30 }
 0x237   :  { %v1141_v57 = vpop.f32.mrb[14].mxu0  ;;  %v3214_v58 = vsel %vm1266_vm15, %v1192_v55, -1e+30  ;;  %v1244_v55 = vsel %vm1236_vm9, 16843009, %v2724_v22  ;;  %vm1273_vm11 = vcmp.ne.s32.totalorder %v1257_v50, 0  ;;  %v406_v50 = vadd.f32 %v3053_v14, %v3185_v16 }
 0x238   :  { %v1193_v61 = vmul.f32 0.35355338, %v1141_v57  ;;  %v1143_v62 = vpop.f32.mrb[15].mxu0  ;;  %v1299_v63 = vmax.f32 %v3212_v46, %v3214_v58  ;;  %v1260_v1 = vunpack.c.1.s8 %v1244_v55  ;;  %vm1641_vm9 = vcmask 1043456  }
 0x239   :  { %v1194_v2 = vmul.f32 0.35355338, %v1143_v62 }
 0x23a   :  { %1300 = vmax.xlane.f32.xlu0 %v1299_v63  ;;  %v3219_v3 = vsel %vm1267_vm3, %v1193_v61, -1e+30  ;;  %v1259_v63 = vunpack.c.0.s8 %v1244_v55  ;;  %vm1276_vm14 = vcmp.ne.s32.totalorder %v1260_v1, 0 }
 0x23b   :  { %v1147_v5 = vpop.f32.mrb[16].mxu0  ;;  %v3221_v7 = vsel %vm1268_vm4, %v1194_v2, -1e+30 }
 0x23c   :  { %v1195_v21 = vmul.f32 0.35355338, %v1147_v5  ;;  %v1149_v26 = vpop.f32.mrb[17].mxu0  ;;  %v1302_v28 = vmax.f32 %v3219_v3, %v3221_v7  ;;  %vm1275_vm13 = vcmp.ne.s32.totalorder %v1259_v63, 0 }
 0x23d   :  { %v1196_v30 = vmul.f32 0.35355338, %v1149_v26 }
 0x23e   :  { %1303 = vmax.xlane.f32.xlu0 %v1302_v28  ;;  %v3225_v31 = vsel %vm1269_vm5, %v1195_v21, -1e+30 }
 0x23f   :  { %v1153_v36 = vpop.f32.mrb[18].mxu0  ;;  %v3228_v39 = vsel %vm1270_vm7, %v1196_v30, -1e+30  ;;  %v1486_v30 = vld [vmem:[%s4127_s10 + $0x80] sm:$0xff] }
 0x240   :  { %v1197_v40 = vmul.f32 0.35355338, %v1153_v36  ;;  %v1155_v42 = vpop.f32.mrb[19].mxu0  ;;  %v1305_v47 = vmax.f32 %v3225_v31, %v3228_v39  ;;  %v2538_v36 = vpack.c.bf16 %v1487_v32, %v1486_v30 }
 0x241   :  { %v1198_v49 = vmul.f32 0.35355338, %v1155_v42  ;;  %v391_v42 = vadd.f32 %v3175_v9, %v3053_v14  ;;  %v416_v9 = vadd.f32 %v3053_v14, %v3189_v19 }
 0x242   :  { %1306 = vmax.xlane.f32.xlu1 %v1305_v47  ;;  %v3232_v51 = vsel %vm1271_vm8, %v1197_v40, -1e+30  ;;  %2539 = vmatprep.subr.bf16.mxu1 %v2538_v36  ;;  %v2121_v40 = vld [vmem:[%s4125_s8] ss:$0 sm:$0xff]  ;;  %v396_v47 = vadd.f32 %v3053_v14, %v3181_v12  ;;  %v411_v12 = vadd.f32 %v3183_v13, %v3053_v14  ;;  %v1473_v36 = vld [vmem:[%s4127_s10 + $0x18] sm:$0xff] }
 0x243   :  { %v1159_v56 = vpop.f32.mrb[20].mxu0  ;;  %v3235_v57 = vsel %vm1272_vm10, %v1198_v49, -1e+30  ;;  %v386_v49 = vadd.f32 %v3053_v14, %v3177_v10  ;;  %v421_v10 = vadd.f32 %v3187_v17, %v3053_v14  ;;  %vm448_vm10 = vcmp.ge.f32.partialorder %v3065_v23, 0.0 }
 0x244   :  { %v1199_v59 = vmul.f32 0.35355338, %v1159_v56  ;;  %v1161_v60 = vpop.f32.mrb[21].mxu0  ;;  %v1308_v61 = vmax.f32 %v3232_v51, %v3235_v57 }
 0x245   :  { %v1200_v62 = vmul.f32 0.35355338, %v1161_v60 }
 0x246   :  { %1309 = vmax.xlane.f32.xlu0 %v1308_v61  ;;  %v3239_v0 = vsel %vm1273_vm11, %v1199_v59, -1e+30  ;;  %vm447_vm11 = vcmp.ge.f32.partialorder %v3069_v25, 0.0 }
 0x247   :  { %v1165_v2 = vpop.f32.mrb[22].mxu0  ;;  %v3241_v4 = vsel %vm1274_vm12, %v1200_v62, -1e+30  ;;  %vm450_vm12 = vcmp.ge.f32.partialorder %v3081_v33, 0.0 }
 0x248   :  { %v1201_v22 = vmul.f32 0.35355338, %v1165_v2  ;;  %v1167_v5 = vpop.f32.mrb[23].mxu0  ;;  %v1311_v20 = vmax.f32 %v3239_v0, %v3241_v4  ;;  %v1470_v2 = vld [vmem:[%s4127_s10] sm:$0xff] }
 0x249   :  { %v1202_v21 = vmul.f32 0.35355338, %v1167_v5 }
 0x24a   :  { %1312 = vmax.xlane.f32.xlu1 %v1311_v20  ;;  %v3245_v26 = vsel %vm1275_vm13, %v1201_v22, -1e+30  ;;  %vm449_vm13 = vcmp.ge.f32.partialorder %v3085_v35, 0.0 }
 0x24b   :  { %v3247_v28 = vsel %vm1276_vm14, %v1202_v21, -1e+30  ;;  %vm452_vm14 = vcmp.ge.f32.partialorder %v3097_v43, 0.0 }
 0x24c   :  { %v1314_v29 = vmax.f32 %v3245_v26, %v3247_v28 }
 0x24e   :  { %1315 = vmax.xlane.f32.xlu0 %v1314_v29 }
 0x25b   :  { %612 = vrot.lane.b32.xlu1 %v2121_v40, %s2725_s0 }
 0x25f   :  { %633 = vrot.lane.b32.xlu1 %v391_v42, %s2725_s0 }
 0x263   :  { %635 = vrot.lane.b32.xlu1 %v396_v47, %s2725_s0  ;;  %v1490_v47 = vld [vmem:[%s4127_s10 + $0xa0] sm:$0xff] }
 0x264   :  { %631 = vrot.lane.b32.xlu0 %v386_v49, %s2725_s0  ;;  %v1491_v49 = vld [vmem:[%s4127_s10 + $0xa8] sm:$0xff] }
 0x267   :  { %639 = vrot.lane.b32.xlu1 %v406_v50, %s2725_s0 }
 0x268   :  { %637 = vrot.lane.b32.xlu0 %v401_v52, %s2725_s0 }
 0x26b   :  { %643 = vrot.lane.b32.xlu1 %v416_v9, %s2725_s0 }
 0x26c   :  { %641 = vrot.lane.b32.xlu0 %v411_v12, %s2725_s0 }
 0x270   :  { %645 = vrot.lane.b32.xlu0 %v421_v10, %s2725_s0  ;;  %v2546_v10 = vpack.c.bf16 %v1491_v49, %v1490_v47 }
 0x2bf   :  { %v1295_v11 = vpop.xlane.xlu0 %1294 }
 0x2c0   :  { %v1317_v16 = vsub.f32 %v3198_v6, %v1295_v11  ;;  %v1318_v55 = vsub.f32 %v3200_v8, %v1295_v11  ;;  %v1474_v11 = vld [vmem:[%s4127_s10 + $0x20] sm:$0xff] }
 0x2c2   :  { %v1333_v19 = vmul.f32 1.442695, %v1317_v16  ;;  %v1335_v56 = vmul.f32 1.442695, %v1318_v55  ;;  %v1475_v16 = vld [vmem:[%s4127_s10 + $0x28] sm:$0xff] }
 0x2c3   :  { %v1298_v59 = vpop.xlane.xlu1 %1297 }
 0x2c4   :  { %2579 = vpow2.f32 %v1333_v19  ;;  %v1319_v13 = vsub.f32 %v3205_v37, %v1298_v59  ;;  %v1320_v60 = vsub.f32 %v3207_v41, %v1298_v59  ;;  %v1471_v37 = vld [vmem:[%s4127_s10 + $0x8] sm:$0xff]  ;;  %v1493_v59 = vld [vmem:[%s4127_s10 + $0xb8] sm:$0xff] }
 0x2c5   :  { %2581 = vpow2.f32 %v1335_v56  ;;  %v2540_v29 = vpack.c.bf16 %v1471_v37, %v1470_v2  ;;  %v1492_v56 = vld [vmem:[%s4127_s10 + $0xb0] sm:$0xff]  ;;  %v1495_v2 = vld [vmem:[%s4127_s10 + $0xc8] sm:$0xff] }
 0x2c6   :  { %v1337_v61 = vmul.f32 1.442695, %v1319_v13  ;;  %v1339_v14 = vmul.f32 1.442695, %v1320_v60 }
 0x2c7   :  { %v1301_v17 = vpop.xlane.xlu0 %1300 }
 0x2c8   :  { %2583 = vpow2.f32 %v1337_v61  ;;  %v1321_v62 = vsub.f32 %v3212_v46, %v1301_v17  ;;  %v1322_v63 = vsub.f32 %v3214_v58, %v1301_v17  ;;  %v1488_v46 = vld [vmem:[%s4127_s10 + $0x90] sm:$0xff]  ;;  %v1489_v58 = vld [vmem:[%s4127_s10 + $0x98] sm:$0xff]  ;;  %v2550_v17 = vpack.c.bf16 %v1493_v59, %v1492_v56 }
 0x2c9   :  { %2585 = vpow2.f32 %v1339_v14  ;;  %v2548_v14 = vpack.c.bf16 %v1475_v16, %v1474_v11 }
 0x2ca   :  { %v1341_v6 = vmul.f32 1.442695, %v1321_v62  ;;  %v1343_v8 = vmul.f32 1.442695, %v1322_v63  ;;  %v1476_v62 = vld [vmem:[%s4127_s10 + $0x30] sm:$0xff]  ;;  %v1477_v63 = vld [vmem:[%s4127_s10 + $0x38] sm:$0xff] }
 0x2cb   :  { %v1304_v1 = vpop.xlane.xlu0 %1303 }
 0x2cc   :  { %2587 = vpow2.f32 %v1341_v6  ;;  %v1323_v41 = vsub.f32 %v3219_v3, %v1304_v1  ;;  %v1324_v22 = vsub.f32 %v3221_v7, %v1304_v1  ;;  %v2542_v3 = vpack.c.bf16 %v1489_v58, %v1488_v46  ;;  %v1472_v7 = vld [vmem:[%s4127_s10 + $0x10] sm:$0xff]  ;;  %v1494_v1 = vld [vmem:[%s4127_s10 + $0xc0] sm:$0xff] }
 0x2cd   :  { %2589 = vpow2.f32 %v1343_v8  ;;  %v2544_v12 = vpack.c.bf16 %v1473_v36, %v1472_v7  ;;  %v2552_v46 = vpack.c.bf16 %v1477_v63, %v1476_v62  ;;  %v1496_v7 = vld [vmem:[%s4127_s10 + $0xd0] sm:$0xff]  ;;  %v1497_v36 = vld [vmem:[%s4127_s10 + $0xd8] sm:$0xff] }
 0x2ce   :  { %v3305_v5 = vpop.eup %2579  ;;  %v1345_v20 = vmul.f32 1.442695, %v1323_v41  ;;  %v1347_v21 = vmul.f32 1.442695, %v1324_v22  ;;  %v2558_v11 = vpack.c.bf16 %v1497_v36, %v1496_v7 }
 0x2cf   :  { %v3307_v30 = vpop.eup %2581  ;;  %v1307_v32 = vpop.xlane.xlu1 %1306 }
 0x2d0   :  { %2591 = vpow2.f32 %v1345_v20  ;;  %1429 = vmatprep.mubr.f32.mxu1 %v3307_v30  ;;  %v1325_v40 = vsub.f32 %v3225_v31, %v1307_v32  ;;  %v1326_v42 = vsub.f32 %v3228_v39, %v1307_v32 }
 0x2d1   :  { %2593 = vpow2.f32 %v1347_v21  ;;  %1430 = vmatmul.mubr.f32.vlgmr.msra.gmra.mrb[16].mxu1 %v3305_v5 }
 0x2d2   :  { %v3325_v50 = vpop.eup %2583  ;;  %v1349_v52 = vmul.f32 1.442695, %v1325_v40  ;;  %v1351_v9 = vmul.f32 1.442695, %v1326_v42  ;;  %2541 = vmatpush3.bf16.msra.mxu1 %v2540_v29  ;;  %v2554_v29 = vpack.c.bf16 %v1495_v2, %v1494_v1 }
 0x2d3   :  { %v3327_v31 = vpop.eup %2585  ;;  %v1310_v39 = vpop.xlane.xlu0 %1309  ;;  %2543 = vmatprep.subr.bf16.mxu1 %v2542_v3 }
 0x2d4   :  { %2595 = vpow2.f32 %v1349_v52  ;;  %1434 = vmatprep.mubr.f32.mxu1 %v3327_v31  ;;  %v1327_v55 = vsub.f32 %v3232_v51, %v1310_v39  ;;  %v1328_v19 = vsub.f32 %v3235_v57, %v1310_v39  ;;  %v1480_v52 = vld [vmem:[%s4127_s10 + $0x50] sm:$0xff] }
 0x2d5   :  { %2597 = vpow2.f32 %v1351_v9  ;;  %1435 = vmatmul.mubr.f32.gmra.mrb[18].mxu1 %v3325_v50  ;;  %v1481_v9 = vld [vmem:[%s4127_s10 + $0x58] sm:$0xff] }
 0x2d6   :  { %v3345_v13 = vpop.eup %2587  ;;  %v1353_v60 = vmul.f32 1.442695, %v1327_v55  ;;  %v1355_v61 = vmul.f32 1.442695, %v1328_v19  ;;  %2545 = vmatpush3.bf16.msra.mxu1 %v2544_v12  ;;  %v1499_v55 = vld [vmem:[%s4127_s10 + $0xe8] sm:$0xff]  ;;  %v2560_v59 = vpack.c.bf16 %v1481_v9, %v1480_v52 }
 0x2d7   :  { %v3347_v51 = vpop.eup %2589  ;;  %v1313_v57 = vpop.xlane.xlu1 %1312  ;;  %2547 = vmatprep.subr.bf16.mxu1 %v2546_v10 }
 0x2d8   :  { %2599 = vpow2.f32 %v1353_v60  ;;  %1439 = vmatprep.mubr.f32.mxu1 %v3347_v51  ;;  %v1329_v6 = vsub.f32 %v3239_v0, %v1313_v57  ;;  %v1330_v8 = vsub.f32 %v3241_v4, %v1313_v57  ;;  %v1478_v0 = vld [vmem:[%s4127_s10 + $0x40] sm:$0xff]  ;;  %v1479_v4 = vld [vmem:[%s4127_s10 + $0x48] sm:$0xff] }
 0x2d9   :  { %2601 = vpow2.f32 %v1355_v61  ;;  %1440 = vmatmul.mubr.f32.gmra.mrb[20].mxu1 %v3345_v13  ;;  %v2556_v40 = vpack.c.bf16 %v1479_v4, %v1478_v0  ;;  %v1482_v60 = vld [vmem:[%s4127_s10 + $0x60] sm:$0xff]  ;;  %v1483_v61 = vld [vmem:[%s4127_s10 + $0x68] sm:$0xff] }
 0x2da   :  { %v3365_v37 = vpop.eup %2591  ;;  %v1357_v41 = vmul.f32 1.442695, %v1329_v6  ;;  %v1359_v22 = vmul.f32 1.442695, %v1330_v8  ;;  %2549 = vmatpush3.bf16.msra.mxu1 %v2548_v14  ;;  %v2564_v4 = vpack.c.bf16 %v1483_v61, %v1482_v60 }
 0x2db   :  { %v3373_v58 = vpop.eup %2593  ;;  %v3375_v20 = vpop.permute.xlu1 %612  ;;  %2551 = vmatprep.subr.bf16.mxu1 %v2550_v17 }
 0x2dc   :  { %v1316_v21 = vpop.xlane.xlu0 %1315  ;;  %2603 = vpow2.f32 %v1357_v41  ;;  %1444 = vmatprep.mubr.f32.mxu1 %v3373_v58  ;;  %v617_v19 = vadd.f32 %v3375_v20, %v3072_v27  ;;  %v618_v56 = vadd.f32 %v3067_v24, %v3375_v20  ;;  %v1500_v41 = vld [vmem:[%s4127_s10 + $0xf0] sm:$0xff]  ;;  %v620_v0 = vadd.f32 %v3083_v34, %v3375_v20 }
 0x2dd   :  { %v1331_v32 = vsub.f32 %v3245_v26, %v1316_v21  ;;  %v1332_v3 = vsub.f32 %v3247_v28, %v1316_v21  ;;  %2605 = vpow2.f32 %v1359_v22  ;;  %1445 = vmatmul.mubr.f32.gmra.mrb[22].mxu1 %v3365_v37  ;;  %v616_v26 = vadd.f32 %v3055_v15, %v3375_v20  ;;  %v1501_v22 = vld [vmem:[%s4127_s10 + $0xf8] sm:$0xff]  ;;  %v1484_v21 = vld [vmem:[%s4127_s10 + $0x70] sm:$0xff] }
 0x2de   :  { %v3387_v42 = vpop.eup %2595  ;;  %2553 = vmatpush3.bf16.msra.mxu1 %v2552_v46  ;;  %v615_v28 = vadd.f32 %v3375_v20, %v3058_v18  ;;  %v1498_v18 = vld [vmem:[%s4127_s10 + $0xe0] sm:$0xff]  ;;  %v619_v46 = vadd.f32 %v3375_v20, %v3088_v38  ;;  %v621_v52 = vadd.f32 %v3375_v20, %v3104_v48  ;;  %v622_v9 = vadd.f32 %v3099_v44, %v3375_v20 }
 0x2df   :  { %v1361_v47 = vmul.f32 1.442695, %v1331_v32  ;;  %v1363_v49 = vmul.f32 1.442695, %v1332_v3  ;;  %v3399_v12 = vpop.eup %2597  ;;  %v634_v39 = vpop.permute.xlu1 %633  ;;  %2555 = vmatprep.subr.bf16.mxu1 %v2554_v29  ;;  %v2562_v63 = vpack.c.bf16 %v1499_v55, %v1498_v18  ;;  %v1485_v29 = vld [vmem:[%s4127_s10 + $0x78] sm:$0xff] }
 0x2e0   :  { %v632_v10 = vpop.permute.xlu0 %631  ;;  %1449 = vmatprep.mubr.f32.mxu1 %v3399_v12  ;;  %v656_v15 = vadd.f32 %v634_v39, %v616_v26  ;;  %v2568_v39 = vpack.c.bf16 %v1485_v29, %v1484_v21  ;;  %v460_v29 = vmul.f32 0.2, %v3097_v43 }
 0x2e1   :  { %2607 = vpow2.f32 %v1361_v47  ;;  %v655_v16 = vadd.f32 %v632_v10, %v615_v28  ;;  %1450 = vmatmul.mubr.f32.gmra.mrb[24].mxu1 %v3387_v42 }
 0x2e2   :  { %2609 = vpow2.f32 %v1363_v49  ;;  %v3419_v14 = vpop.eup %2599  ;;  %v672_v57 = vmul.f32 0.2, %v656_v15  ;;  %2557 = vmatpush3.bf16.msra.mxu1 %v2556_v40  ;;  %vm664_vm15 = vcmp.ge.f32.partialorder %v656_v15, 0.0  ;;  %v2566_v40 = vpack.c.bf16 %v1501_v22, %v1500_v41 }
 0x2e3   :  { %v671_v17 = vmul.f32 0.2, %v655_v16  ;;  %vm663_vm1 = vcmp.ge.f32.partialorder %v655_v16, 0.0  ;;  %v3421_v27 = vpop.eup %2601  ;;  %v636_v62 = vpop.permute.xlu1 %635  ;;  %2559 = vmatprep.subr.bf16.mxu1 %v2558_v11  ;;  %v458_v22 = vmul.f32 0.2, %v3081_v33 }
 0x2e4   :  { %v638_v24 = vpop.permute.xlu0 %637  ;;  %1454 = vmatprep.mubr.f32.mxu1 %v3421_v27  ;;  %v657_v6 = vadd.f32 %v636_v62, %v617_v19  ;;  %v3424_v1 = vsel %vm664_vm15, %v656_v15, %v672_v57  ;;  %vm451_vm15 = vcmp.ge.f32.partialorder %v3101_v45, 0.0 }
 0x2e5   :  { %v658_v8 = vadd.f32 %v638_v24, %v618_v56  ;;  %v3426_v2 = vsel %vm663_vm1, %v655_v16, %v671_v17  ;;  %1455 = vmatmul.mubr.f32.gmra.mrb[26].mxu1 %v3419_v14  ;;  %697 = vrot.lane.b32.xlu0 %v3424_v1, %s2726_s6  ;;  %v455_v24 = vmul.f32 0.2, %v3069_v25  ;;  %vm454_vm1 = vcmp.ge.f32.partialorder %v3113_v53, 0.0 }
 0x2e6   :  { %v2604_v32 = vpop.eup %2603  ;;  %v673_v3 = vmul.f32 0.2, %v657_v6  ;;  %2561 = vmatpush3.bf16.msra.mxu1 %v2560_v59  ;;  %695 = vrot.lane.b32.xlu1 %v3426_v2, %s2726_s6  ;;  %vm665_vm3 = vcmp.ge.f32.partialorder %v657_v6, 0.0 }
 0x2e7   :  { %v674_v7 = vmul.f32 0.2, %v658_v8  ;;  %vm666_vm4 = vcmp.ge.f32.partialorder %v658_v8, 0.0  ;;  %v2606_v38 = vpop.eup %2605  ;;  %v640_v34 = vpop.permute.xlu1 %639  ;;  %2563 = vmatprep.subr.bf16.mxu1 %v2562_v63 }
 0x2e8   :  { %v642_v36 = vpop.permute.xlu0 %641  ;;  %1459 = vmatprep.mubr.f32.mxu1 %v2606_v38  ;;  %v659_v47 = vadd.f32 %v640_v34, %v619_v46  ;;  %v3449_v26 = vsel %vm665_vm3, %v657_v6, %v673_v3  ;;  %v3509_v46 = vsel %vm447_vm11, %v3069_v25, %v455_v24  ;;  %v461_v34 = vmul.f32 0.2, %v3115_v54 }
 0x2e9   :  { %v660_v49 = vadd.f32 %v642_v36, %v620_v0  ;;  %v3451_v28 = vsel %vm666_vm4, %v658_v8, %v674_v7  ;;  %1460 = vmatmul.mubr.f32.gmra.mrb[28].mxu1 %v2604_v32  ;;  %v457_v0 = vmul.f32 0.2, %v3085_v35  ;;  %v471_v21 = vsel %vm90_vm0, %v3509_v46, 0.0 }
 0x2ea   :  { %701 = vrot.lane.b32.xlu0 %v3451_v28, %s2726_s6  ;;  %v675_v11 = vmul.f32 0.2, %v659_v47  ;;  %2565 = vmatpush3.bf16.msra.mxu1 %v2564_v4  ;;  %vm667_vm5 = vcmp.ge.f32.partialorder %v659_v47, 0.0  ;;  %vm453_vm3 = vcmp.ge.f32.partialorder %v3115_v54, 0.0  ;;  %vm1616_vm4 = vcmask 31744  }
 0x2eb   :  { %v2608_v10 = vpop.eup %2607  ;;  %v676_v15 = vmul.f32 0.2, %v660_v49  ;;  %699 = vrot.lane.b32.xlu1 %v3449_v26, %s2726_s6  ;;  %vm668_vm6 = vcmp.ge.f32.partialorder %v660_v49, 0.0  ;;  %v644_v18 = vpop.permute.xlu1 %643  ;;  %2567 = vmatprep.subr.bf16.mxu1 %v2566_v40  ;;  %v3523_v25 = vsel %vm449_vm13, %v3085_v35, %v457_v0  ;;  %vm2060_vm13 = vcmask 785408  }
 0x2ec   :  { %v2610_v16 = vpop.eup %2609  ;;  %v646_v55 = vpop.permute.xlu0 %645  ;;  %v661_v19 = vadd.f32 %v644_v18, %v621_v52  ;;  %v3461_v56 = vsel %vm667_vm5, %v659_v47, %v675_v11  ;;  %v477_v7 = vsel %vm90_vm0, %v3523_v25, 0.0 }
 0x2ed   :  { %1464 = vmatprep.mubr.f32.mxu1 %v2610_v16  ;;  %v662_v48 = vadd.f32 %v646_v55, %v622_v9  ;;  %v3463_v44 = vsel %vm668_vm6, %v660_v49, %v676_v15 }
 0x2ee   :  { %1465 = vmatmul.mubr.f32.gmra.mrb[30].mxu1 %v2608_v10  ;;  %705 = vrot.lane.b32.xlu0 %v3463_v44, %s2726_s6  ;;  %v677_v20 = vmul.f32 0.2, %v661_v19  ;;  %vm669_vm7 = vcmp.ge.f32.partialorder %v661_v19, 0.0 }
 0x2ef   :  { %v678_v59 = vmul.f32 0.2, %v662_v48  ;;  %2569 = vmatpush3.bf16.msra.mxu1 %v2568_v39  ;;  %1566 = vmatprep.mubr.f32.mxu1 %v3307_v30  ;;  %vm670_vm8 = vcmp.ge.f32.partialorder %v662_v48, 0.0 }
 0x2f0   :  { %703 = vrot.lane.b32.xlu1 %v3461_v56, %s2726_s6  ;;  %v3470_v60 = vsel %vm669_vm7, %v661_v19, %v677_v20 }
 0x2f1   :  { %v3472_v61 = vsel %vm670_vm8, %v662_v48, %v678_v59 }
 0x2f2   :  { %1567 = vmatmul.mubr.f32.vlgmr.msra.gmra.mrb[32].mxu1 %v3305_v5  ;;  %709 = vrot.lane.b32.xlu0 %v3472_v61, %s2726_s6  ;;  %v1615_v5 = vld [vmem:[%s4128_s11] sm:$0xf] }
 0x2f3   :  { %1571 = vmatprep.mubr.f32.mxu1 %v3327_v31  ;;  %2428 = vmatprep.subr.msk.mxu0 %vm1641_vm9, %v1615_v5 }
 0x2f4   :  { %707 = vrot.lane.b32.xlu1 %v3470_v60, %s2726_s6  ;;  %2570 = vmatprep.subr.msk.mxu1 %vm1641_vm9, %v1615_v5 }
 0x2f5   :  { %2429 = vmatpush3.msk.msra.mxu0 %vm1641_vm9, %v1615_v5  ;;  %2571 = vmatpush3.msk.msra.mxu1 %vm1641_vm9, %v1615_v5 }
 0x2f6   :  { %1572 = vmatmul.mubr.f32.gmra.mrb[34].mxu1 %v3325_v50 }
 0x2f7   :  { %1576 = vmatprep.mubr.f32.mxu1 %v3347_v51 }
 0x2fa   :  { %1577 = vmatmul.mubr.f32.gmra.mrb[36].mxu1 %v3345_v13 }
 0x2fb   :  { %1581 = vmatprep.mubr.f32.mxu1 %v3373_v58 }
 0x2fe   :  { %1582 = vmatmul.mubr.f32.gmra.mrb[38].mxu1 %v3365_v37 }
 0x2ff   :  { %1586 = vmatprep.mubr.f32.mxu1 %v3399_v12 }
 0x302   :  { %1587 = vmatmul.mubr.f32.gmra.mrb[40].mxu1 %v3387_v42 }
 0x303   :  { %1591 = vmatprep.mubr.f32.mxu1 %v3421_v27  ;;  %v456_v27 = vmul.f32 0.2, %v3065_v23 }
 0x305   :  { %v3505_v41 = vsel %vm448_vm10, %v3065_v23, %v456_v27  ;;  %v3519_v23 = vsel %vm450_vm12, %v3081_v33, %v458_v22  ;;  %v3533_v33 = vsel %vm452_vm14, %v3097_v43, %v460_v29 }
 0x306   :  { %1592 = vmatmul.mubr.f32.gmra.mrb[42].mxu1 %v3419_v14  ;;  %v474_v4 = vsel %vm90_vm0, %v3505_v41, 0.0  ;;  %v480_v3 = vsel %vm90_vm0, %v3519_v23, 0.0  ;;  %v486_v36 = vsel %vm90_vm0, %v3533_v33, 0.0 }
 0x307   :  { %1596 = vmatprep.mubr.f32.mxu1 %v2606_v38  ;;  %v462_v38 = vmul.f32 0.2, %v3113_v53 }
 0x309   :  { %v3547_v43 = vsel %vm454_vm1, %v3113_v53, %v462_v38 }
 0x30a   :  { %1597 = vmatmul.mubr.f32.gmra.mrb[44].mxu1 %v2604_v32  ;;  %v459_v32 = vmul.f32 0.2, %v3101_v45  ;;  %v492_v47 = vsel %vm90_vm0, %v3547_v43, 0.0 }
 0x30b   :  { %1601 = vmatprep.mubr.f32.mxu1 %v2610_v16 }
 0x30c   :  { %v3537_v35 = vsel %vm451_vm15, %v3101_v45, %v459_v32  ;;  %v3550_v45 = vsel %vm453_vm3, %v3115_v54, %v461_v34 }
 0x30d   :  { %v483_v40 = vsel %vm90_vm0, %v3537_v35, 0.0  ;;  %v489_v49 = vsel %vm90_vm0, %v3550_v45, 0.0 }
 0x30e   :  { %1602 = vmatmul.mubr.f32.gmra.mrb[46].mxu1 %v2608_v10 }
 0x357   :  { %v698_v30 = vpop.permute.xlu0 %697 }
 0x358   :  { %v696_v50 = vpop.permute.xlu1 %695  ;;  %v722_v31 = vsel %vm90_vm0, %v698_v30, 0.0 }
 0x359   :  { %v719_v13 = vsel %vm90_vm0, %v696_v50, 0.0  ;;  %723 = vadd.xlane.f32.xlu0 %v722_v31 }
 0x35a   :  { %720 = vadd.xlane.f32.xlu1 %v719_v13 }
 0x35c   :  { %v702_v51 = vpop.permute.xlu0 %701 }
 0x35d   :  { %v700_v37 = vpop.permute.xlu1 %699  ;;  %v728_v58 = vsel %vm90_vm0, %v702_v51, 0.0 }
 0x35e   :  { %v725_v42 = vsel %vm90_vm0, %v700_v37, 0.0  ;;  %729 = vadd.xlane.f32.xlu1 %v728_v58 }
 0x35f   :  { %726 = vadd.xlane.f32.xlu0 %v725_v42 }
 0x360   :  { %v706_v12 = vpop.permute.xlu0 %705 }
 0x361   :  { %v734_v14 = vsel %vm90_vm0, %v706_v12, 0.0 }
 0x362   :  { %v704_v57 = vpop.permute.xlu1 %703  ;;  %735 = vadd.xlane.f32.xlu1 %v734_v14 }
 0x363   :  { %v731_v17 = vsel %vm90_vm0, %v704_v57, 0.0 }
 0x364   :  { %732 = vadd.xlane.f32.xlu0 %v731_v17  ;;  %v710_v62 = vpop.permute.xlu0 %709 }
 0x365   :  { %v740_v63 = vsel %vm90_vm0, %v710_v62, 0.0 }
 0x366   :  { %v708_v6 = vpop.permute.xlu1 %707  ;;  %741 = vadd.xlane.f32.xlu1 %v740_v63 }
 0x367   :  { %v737_v8 = vsel %vm90_vm0, %v708_v6, 0.0 }
 0x368   :  { %738 = vadd.xlane.f32.xlu0 %v737_v8 }
 0x36a   :  { %475 = vadd.xlane.f32.xlu1 %v474_v4 }
 0x36c   :  { %472 = vadd.xlane.f32.xlu0 %v471_v21 }
 0x36e   :  { %481 = vadd.xlane.f32.xlu1 %v480_v3 }
 0x370   :  { %478 = vadd.xlane.f32.xlu0 %v477_v7 }
 0x372   :  { %487 = vadd.xlane.f32.xlu1 %v486_v36 }
 0x374   :  { %484 = vadd.xlane.f32.xlu0 %v483_v40 }
 0x376   :  { %493 = vadd.xlane.f32.xlu1 %v492_v47 }
 0x378   :  { %490 = vadd.xlane.f32.xlu0 %v489_v49 }
 0x3a4   :  { %v2287_v52 = vpop.f32.mrb[16].mxu1 }
 0x3a5   :  { %v2288_v9 = vpop.f32.mrb[17].mxu1 }
 0x3a6   :  { %v3556_v39 = vadd.f32 %v2288_v9, %v2287_v52 }
 0x3a8   :  { %v2290_v10 = vpop.f32.mrb[18].mxu1 }
 0x3a9   :  { %v2291_v11 = vpop.f32.mrb[19].mxu1 }
 0x3aa   :  { %v3558_v53 = vadd.f32 %v2291_v11, %v2290_v10 }
 0x3ac   :  { %v2293_v15 = vpop.f32.mrb[20].mxu1 }
 0x3ad   :  { %v2294_v16 = vpop.f32.mrb[21].mxu1 }
 0x3ae   :  { %v3560_v54 = vadd.f32 %v2294_v16, %v2293_v15 }
 0x3b0   :  { %v2296_v18 = vpop.f32.mrb[22].mxu1 }
 0x3b1   :  { %v2297_v55 = vpop.f32.mrb[23].mxu1 }
 0x3b2   :  { %v3562_v19 = vadd.f32 %v2297_v55, %v2296_v18 }
 0x3b4   :  { %v2299_v48 = vpop.f32.mrb[24].mxu1 }
 0x3b5   :  { %v2300_v20 = vpop.f32.mrb[25].mxu1 }
 0x3b6   :  { %v3564_v59 = vadd.f32 %v2300_v20, %v2299_v48 }
 0x3b8   :  { %v2302_v5 = vpop.f32.mrb[26].mxu1 }
 0x3b9   :  { %v2303_v30 = vpop.f32.mrb[27].mxu1 }
 0x3ba   :  { %v3566_v50 = vadd.f32 %v2303_v30, %v2302_v5 }
 0x3bc   :  { %v2305_v31 = vpop.f32.mrb[28].mxu1 }
 0x3bd   :  { %v2306_v13 = vpop.f32.mrb[29].mxu1 }
 0x3be   :  { %v3568_v51 = vadd.f32 %v2306_v13, %v2305_v31 }
 0x3c1   :  { %v2308_v37 = vpop.f32.mrb[30].mxu1 }
 0x3c2   :  { %v2309_v58 = vpop.f32.mrb[31].mxu1 }
 0x3c3   :  { %v3570_v42 = vadd.f32 %v2309_v58, %v2308_v37 }
 0x3c5   :  { %v2343_v12 = vpop.f32.mrb[32].mxu1 }
 0x3c6   :  { %v2344_v14 = vpop.f32.mrb[33].mxu1 }
 0x3c7   :  { %v2345_v57 = vadd.f32 %v2344_v14, %v2343_v12 }
 0x3c9   :  { %v1607_v17 = vmax.f32 %v2345_v57, 1e-30  ;;  %v2346_v27 = vpop.f32.mrb[34].mxu1 }
 0x3ca   :  { %v2347_v62 = vpop.f32.mrb[35].mxu1 }
 0x3cb   :  { %v2348_v24 = vadd.f32 %v2347_v62, %v2346_v27  ;;  %2430 = vmatprep.mubr.msk.f32.mxu0 %vm1616_vm4, %v1607_v17 }
 0x3cd   :  { %v1608_v63 = vmax.f32 %v2348_v24, 1e-30  ;;  %v2349_v6 = vpop.f32.mrb[36].mxu1 }
 0x3ce   :  { %v2350_v8 = vpop.f32.mrb[37].mxu1 }
 0x3cf   :  { %v2351_v22 = vadd.f32 %v2350_v8, %v2349_v6  ;;  %2431 = vmatmul.mubr.msk.f32.vlgmr.msra.gmra.mrb[24].mxu0 %vm1616_vm4, %v1608_v63 }
 0x3d1   :  { %v1609_v0 = vmax.f32 %v2351_v22, 1e-30  ;;  %v2352_v4 = vpop.f32.mrb[38].mxu1 }
 0x3d2   :  { %v2353_v21 = vpop.f32.mrb[39].mxu1 }
 0x3d3   :  { %v2354_v29 = vadd.f32 %v2353_v21, %v2352_v4  ;;  %2433 = vmatprep.mubr.msk.f32.mxu0 %vm1616_vm4, %v1609_v0 }
 0x3d5   :  { %v1610_v32 = vmax.f32 %v2354_v29, 1e-30  ;;  %v2355_v3 = vpop.f32.mrb[40].mxu1 }
 0x3d6   :  { %v2356_v7 = vpop.f32.mrb[41].mxu1 }
 0x3d7   :  { %v2357_v38 = vadd.f32 %v2356_v7, %v2355_v3  ;;  %2434 = vmatmul.mubr.msk.f32.gmra.mrb[26].mxu0 %vm1616_vm4, %v1610_v32 }
 0x3d9   :  { %v1611_v34 = vmax.f32 %v2357_v38, 1e-30  ;;  %v2358_v36 = vpop.f32.mrb[42].mxu1 }
 0x3da   :  { %v2359_v40 = vpop.f32.mrb[43].mxu1 }
 0x3db   :  { %v2360_v47 = vadd.f32 %v2359_v40, %v2358_v36  ;;  %2436 = vmatprep.mubr.msk.f32.mxu1 %vm1616_vm4, %v1611_v34 }
 0x3dd   :  { %v1612_v49 = vmax.f32 %v2360_v47, 1e-30  ;;  %v2361_v52 = vpop.f32.mrb[44].mxu1 }
 0x3de   :  { %v2362_v9 = vpop.f32.mrb[45].mxu1 }
 0x3df   :  { %v2363_v10 = vadd.f32 %v2362_v9, %v2361_v52  ;;  %2437 = vmatmul.mubr.msk.f32.vlgmr.msra.gmra.mrb[48].mxu1 %vm1616_vm4, %v1612_v49 }
 0x3e1   :  { %v1613_v11 = vmax.f32 %v2363_v10, 1e-30  ;;  %v2364_v15 = vpop.f32.mrb[46].mxu1 }
 0x3e2   :  { %v2365_v16 = vpop.f32.mrb[47].mxu1 }
 0x3e3   :  { %v2366_v18 = vadd.f32 %v2365_v16, %v2364_v15  ;;  %2439 = vmatprep.mubr.msk.f32.mxu1 %vm1616_vm4, %v1613_v11 }
 0x3e5   :  { %v1614_v55 = vmax.f32 %v2366_v18, 1e-30 }
 0x3e6   :  { %v3580_v48 = vpop.xlane.xlu0 %723 }
 0x3e7   :  { %2440 = vmatmul.mubr.msk.f32.gmra.mrb[50].mxu1 %vm1616_vm4, %v1614_v55  ;;  %v3582_v20 = vpop.xlane.xlu1 %720 }
 0x3eb   :  { %v3584_v5 = vpop.xlane.xlu1 %729 }
 0x3ec   :  { %v3586_v30 = vpop.xlane.xlu0 %726 }
 0x3ef   :  { %v3588_v31 = vpop.xlane.xlu1 %735 }
 0x3f1   :  { %v3590_v13 = vpop.xlane.xlu0 %732 }
 0x3f3   :  { %v3592_v37 = vpop.xlane.xlu1 %741 }
 0x3f5   :  { %v3594_v58 = vpop.xlane.xlu0 %738 }
 0x3f7   :  { %v476_v12 = vpop.xlane.xlu1 %475 }
 0x3f8   :  { %v497_v14 = vmul.f32 0.03125, %v476_v12 }
 0x3f9   :  { %v473_v57 = vpop.xlane.xlu0 %472 }
 0x3fa   :  { %v496_v17 = vmul.f32 0.03125, %v473_v57  ;;  %v3597_v27 = vsub.f32 %v3505_v41, %v497_v14  ;;  %v2122_v14 = vld [vmem:[%s4131_s14] ss:$0 sm:$0xff]  ;;  %s2699_s14 = scalar_lea.vmem %s2083_s26, 1024 }
 0x3fb   :  { %v482_v24 = vpop.xlane.xlu1 %481  ;;  %v2675_v57 = vld [vmem:[%s4146_s23] sm:$0xff]  ;;  %p2700_p0 = scmp.ne.s32.totalorder %s2083_s26, %s2699_s14  ;;  %p2705_p2 = scmp.lt.s32.totalorder %s2699_s14, %s2699_s14 }
 0x3fc   :  { %v3600_v62 = vsub.f32 %v3509_v46, %v496_v17  ;;  %v499_v63 = vmul.f32 0.03125, %v482_v24  ;;  %v513_v8 = vmul.f32 %v3597_v27, %v3597_v27  ;;  %v2676_v17 = vld [vmem:[%s4146_s23 + $0x10] sm:$0xff]  ;;  %v744_v24 = vmul.f32 0.03125, %v3580_v48  ;;  %v2679_v48 = vld [vmem:[%s4146_s23 + $0x18] sm:$0xff] }
 0x3fd   :  { %v479_v6 = vpop.xlane.xlu0 %478  ;;  %p2706_p3 = por %p2705_p2, %p2704_p1 }
 0x3fe   :  { %v498_v22 = vmul.f32 0.03125, %v479_v6  ;;  %v512_v0 = vmul.f32 %v3600_v62, %v3600_v62  ;;  %v3607_v4 = vsub.f32 %v3519_v23, %v499_v63  ;;  %v523_v21 = vsel %vm90_vm0, %v513_v8, 0.0  ;;  %v2677_v63 = vld [vmem:[%s4146_s23 + $0x8] sm:$0xff]  ;;  %v2678_v6 = vld [vmem:[%s4146_s23 + $0x20] sm:$0xff] }
 0x3ff   :  { %524 = vadd.xlane.f32.xlu1 %v523_v21  ;;  %v488_v46 = vpop.xlane.xlu1 %487  ;;  %v3670_v8 = vsub.f32 %v3424_v1, %v744_v24  ;;  %v2680_v21 = vld [vmem:[%s4146_s23 + $0x30] sm:$0xff]  ;;  %v747_v1 = vmul.f32 0.03125, %v3590_v13  ;;  %v749_v13 = vmul.f32 0.03125, %v3594_v58  ;;  %p2707_p4 = pnand %p2706_p3, %p2700_p0 }
 0x400   :  { %v3611_v41 = vsub.f32 %v3523_v25, %v498_v22  ;;  %v520_v29 = vsel %vm90_vm0, %v512_v0, 0.0  ;;  %v501_v32 = vmul.f32 0.03125, %v488_v46  ;;  %v515_v7 = vmul.f32 %v3607_v4, %v3607_v4 }
 0x401   :  { %v485_v3 = vpop.xlane.xlu0 %484  ;;  %521 = vadd.xlane.f32.xlu0 %v520_v29  ;;  %v745_v22 = vmul.f32 0.03125, %v3586_v30  ;;  %v743_v0 = vmul.f32 0.03125, %v3582_v20  ;;  %v2681_v30 = vld [vmem:[%s4146_s23 + $0x28] sm:$0xff]  ;;  %v760_v20 = vmul.f32 %v3670_v8, %v3670_v8  ;;  %v3715_v58 = vsub.f32 %v3470_v60, %v749_v13 }
 0x402   :  { %v500_v38 = vmul.f32 0.03125, %v485_v3  ;;  %v514_v23 = vmul.f32 %v3611_v41, %v3611_v41  ;;  %v3619_v34 = vsub.f32 %v3533_v33, %v501_v32  ;;  %v529_v25 = vsel %vm90_vm0, %v515_v7, 0.0  ;;  %v2682_v3 = vld [vmem:[%s4146_s23 + $0x38] sm:$0xff] }
 0x403   :  { %530 = vadd.xlane.f32.xlu1 %v529_v25  ;;  %v494_v40 = vpop.xlane.xlu1 %493  ;;  %v3683_v46 = vsub.f32 %v3449_v26, %v745_v22  ;;  %v3693_v29 = vsub.f32 %v3426_v2, %v743_v0  ;;  %v746_v32 = vmul.f32 0.03125, %v3584_v5  ;;  %v3698_v26 = vsub.f32 %v3461_v56, %v747_v1 }
 0x404   :  { %v3623_v36 = vsub.f32 %v3537_v35, %v500_v38  ;;  %v526_v47 = vsel %vm90_vm0, %v514_v23, 0.0  ;;  %v503_v49 = vmul.f32 0.03125, %v494_v40  ;;  %v517_v9 = vmul.f32 %v3619_v34, %v3619_v34 }
 0x405   :  { %527 = vadd.xlane.f32.xlu0 %v526_v47  ;;  %v491_v52 = vpop.xlane.xlu0 %490  ;;  %v761_v7 = vmul.f32 %v3683_v46, %v3683_v46  ;;  %v3708_v2 = vsub.f32 %v3451_v28, %v746_v32  ;;  %v748_v5 = vmul.f32 0.03125, %v3588_v31  ;;  %v759_v56 = vmul.f32 %v3693_v29, %v3693_v29 }
 0x406   :  { %v502_v10 = vmul.f32 0.03125, %v491_v52  ;;  %v516_v33 = vmul.f32 %v3623_v36, %v3623_v36  ;;  %v3631_v11 = vsub.f32 %v3547_v43, %v503_v49  ;;  %v535_v35 = vsel %vm90_vm0, %v517_v9, 0.0 }
 0x407   :  { %536 = vadd.xlane.f32.xlu1 %v535_v35  ;;  %v763_v38 = vmul.f32 %v3698_v26, %v3698_v26  ;;  %v3721_v23 = vsub.f32 %v3463_v44, %v748_v5  ;;  %v750_v28 = vmul.f32 0.03125, %v3592_v37  ;;  %v762_v31 = vmul.f32 %v3708_v2, %v3708_v2 }
 0x408   :  { %v3635_v15 = vsub.f32 %v3550_v45, %v502_v10  ;;  %v532_v16 = vsel %vm90_vm0, %v516_v33, 0.0  ;;  %v519_v18 = vmul.f32 %v3631_v11, %v3631_v11  ;;  %v2123_v45 = vld [vmem:[%s4132_s15] ss:$0 sm:$0xff]  ;;  %v765_v60 = vmul.f32 %v3715_v58, %v3715_v58 }
 0x409   :  { %533 = vadd.xlane.f32.xlu0 %v532_v16  ;;  %v3731_v25 = vsub.f32 %v3472_v61, %v750_v28  ;;  %v764_v44 = vmul.f32 %v3721_v23, %v3721_v23 }
 0x40a   :  { %v518_v55 = vmul.f32 %v3635_v15, %v3635_v15  ;;  %v541_v12 = vsel %vm90_vm0, %v519_v18, 0.0 }
 0x40b   :  { %542 = vadd.xlane.f32.xlu1 %v541_v12  ;;  %v766_v37 = vmul.f32 %v3731_v25, %v3731_v25 }
 0x40c   :  { %v538_v43 = vsel %vm90_vm0, %v518_v55, 0.0 }
 0x40d   :  { %539 = vadd.xlane.f32.xlu0 %v538_v43 }
 0x41c   :  { %878 = vrot.lane.b32.xlu1 %v2123_v45, %s2725_s0 }
 0x420   :  { %1948 = vrot.lane.b32.xlu1 %v2675_v57, %s2725_s0 }
 0x423   :  { %861 = vrot.lane.b32.xlu0 %v2122_v14, %s2725_s0 }
 0x424   :  { %1952 = vrot.lane.b32.xlu1 %v2676_v17, %s2725_s0 }
 0x427   :  { %1950 = vrot.lane.b32.xlu0 %v2677_v63, %s2725_s0 }
 0x428   :  { %1956 = vrot.lane.b32.xlu1 %v2678_v6, %s2725_s0 }
 0x42b   :  { %1954 = vrot.lane.b32.xlu0 %v2679_v48, %s2725_s0 }
 0x42c   :  { %1960 = vrot.lane.b32.xlu1 %v2680_v21, %s2725_s0 }
 0x42f   :  { %1958 = vrot.lane.b32.xlu0 %v2681_v30, %s2725_s0 }
 0x430   :  { %777 = vrot.lane.b32.xlu1 %v760_v20, %s2726_s6 }
 0x433   :  { %1962 = vrot.lane.b32.xlu0 %v2682_v3, %s2725_s0 }
 0x434   :  { %779 = vrot.lane.b32.xlu1 %v761_v7, %s2726_s6 }
 0x437   :  { %775 = vrot.lane.b32.xlu0 %v759_v56, %s2726_s6 }
 0x438   :  { %783 = vrot.lane.b32.xlu1 %v763_v38, %s2726_s6 }
 0x43b   :  { %781 = vrot.lane.b32.xlu0 %v762_v31, %s2726_s6 }
 0x43c   :  { %787 = vrot.lane.b32.xlu1 %v765_v60, %s2726_s6  ;;  %v3786_v60 = vld [vmem:[%s4143_s19 + $0x8] sm:$0xff] }
 0x43f   :  { %785 = vrot.lane.b32.xlu0 %v764_v44, %s2726_s6 }
 0x443   :  { %789 = vrot.lane.b32.xlu0 %v766_v37, %s2726_s6 }
 0x48c   :  { %v3740_v40 = vpop.xlane.xlu1 %524 }
 0x48e   :  { %v3742_v47 = vpop.xlane.xlu0 %521 }
 0x490   :  { %v3744_v49 = vpop.xlane.xlu1 %530 }
 0x492   :  { %v3746_v61 = vpop.xlane.xlu0 %527 }
 0x494   :  { %v3748_v52 = vpop.xlane.xlu1 %536 }
 0x496   :  { %v3750_v9 = vpop.xlane.xlu0 %533 }
 0x498   :  { %v3752_v10 = vpop.xlane.xlu1 %542 }
 0x49a   :  { %v3754_v33 = vpop.xlane.xlu0 %539 }
 0x49c   :  { %v3756_v35 = vpop.permute.xlu1 %878 }
 0x49e   :  { %v3758_v16 = vpop.permute.xlu0 %861 }
 0x4a0   :  { %v3760_v18 = vpop.permute.xlu1 %1948 }
 0x4a2   :  { %v3762_v55 = vpop.permute.xlu0 %1950  ;;  %v2432_v12 = vpop.f32.mrb[24].mxu0 }
 0x4a3   :  { %2611 = vrcp.f32 %v2432_v12  ;;  %v1711_v43 = vpop.f32.mrb[25].mxu0  ;;  %v3793_v12 = vld [vmem:[%s4143_s19] sm:$0xff] }
 0x4a4   :  { %2613 = vrcp.f32 %v1711_v43  ;;  %v3764_v45 = vpop.permute.xlu1 %1952 }
 0x4a6   :  { %v3766_v14 = vpop.permute.xlu0 %1954 }
 0x4a8   :  { %v3768_v57 = vpop.permute.xlu1 %1956 }
 0x4aa   :  { %v3770_v17 = vpop.permute.xlu0 %1958  ;;  %v2435_v24 = vpop.f32.mrb[26].mxu0 }
 0x4ab   :  { %2615 = vrcp.f32 %v2435_v24  ;;  %v1721_v63 = vpop.f32.mrb[27].mxu0 }
 0x4ac   :  { %2617 = vrcp.f32 %v1721_v63  ;;  %v3772_v22 = vpop.permute.xlu1 %1960 }
 0x4ad   :  { %v2612_v6 = vpop.eup %2611 }
 0x4ae   :  { %v2614_v48 = vpop.eup %2613  ;;  %v3774_v0 = vpop.permute.xlu0 %1962  ;;  %v1753_v21 = vmul.f32 %v2612_v6, %v3558_v53 }
 0x4af   :  { %v1751_v1 = vmul.f32 %v2614_v48, %v3556_v39 }
 0x4b0   :  { %v778_v30 = vpop.permute.xlu1 %777  ;;  %v1767_v44 = vadd.f32 %v3786_v60, %v1753_v21 }
 0x4b1   :  { %v802_v13 = vsel %vm90_vm0, %v778_v30, 0.0 }
 0x4b2   :  { %v776_v20 = vpop.permute.xlu0 %775  ;;  %v2438_v32 = vpop.f32.mrb[48].mxu1  ;;  %803 = vadd.xlane.f32.xlu1 %v802_v13  ;;  %vm1775_vm5 = vcmp.ge.f32.partialorder %v1767_v44, 0.0 }
 0x4b3   :  { %2619 = vrcp.f32 %v2438_v32  ;;  %v1731_v3 = vpop.f32.mrb[49].mxu1  ;;  %v799_v7 = vsel %vm90_vm0, %v776_v20, 0.0  ;;  %v3801_v20 = vld [vmem:[%s4143_s19 + $0x10] sm:$0xff]  ;;  %v3807_v32 = vld [vmem:[%s4143_s19 + $0x18] sm:$0xff] }
 0x4b4   :  { %2621 = vrcp.f32 %v1731_v3  ;;  %800 = vadd.xlane.f32.xlu0 %v799_v7  ;;  %v780_v56 = vpop.permute.xlu1 %779 }
 0x4b5   :  { %v2616_v5 = vpop.eup %2615  ;;  %v805_v53 = vsel %vm90_vm0, %v780_v56, 0.0  ;;  %v545_v56 = vmul.f32 0.03125, %v3740_v40 }
 0x4b6   :  { %v2618_v38 = vpop.eup %2617  ;;  %v782_v28 = vpop.permute.xlu0 %781  ;;  %v1757_v39 = vmul.f32 %v2616_v5, %v3562_v19  ;;  %v1766_v19 = vadd.f32 %v3793_v12, %v1751_v1 }
 0x4b7   :  { %v808_v31 = vsel %vm90_vm0, %v782_v28, 0.0  ;;  %v1755_v37 = vmul.f32 %v2618_v38, %v3560_v54  ;;  %v1783_v54 = vmul.f32 0.2, %v1767_v44 }
 0x4b8   :  { %806 = vadd.xlane.f32.xlu0 %v805_v53  ;;  %809 = vadd.xlane.f32.xlu1 %v808_v31  ;;  %v784_v43 = vpop.permute.xlu1 %783  ;;  %v1782_v30 = vmul.f32 0.2, %v1766_v19  ;;  %v1769_v13 = vadd.f32 %v3807_v32, %v1757_v39  ;;  %vm1774_vm6 = vcmp.ge.f32.partialorder %v1766_v19, 0.0  ;;  %v544_v31 = vmul.f32 0.03125, %v3742_v47 }
 0x4b9   :  { %v811_v6 = vsel %vm90_vm0, %v784_v43, 0.0  ;;  %v1768_v1 = vadd.f32 %v3801_v20, %v1755_v37  ;;  %v3816_v43 = vsel %vm1775_vm5, %v1767_v44, %v1783_v54  ;;  %v546_v47 = vmul.f32 0.03125, %v3746_v61 }
 0x4ba   :  { %v786_v24 = vpop.permute.xlu0 %785  ;;  %v2441_v63 = vpop.f32.mrb[50].mxu1  ;;  %v1785_v40 = vmul.f32 0.2, %v1769_v13  ;;  %vm1777_vm8 = vcmp.ge.f32.partialorder %v1769_v13, 0.0 }
 0x4bb   :  { %2623 = vrcp.f32 %v2441_v63  ;;  %v1741_v48 = vpop.f32.mrb[51].mxu1  ;;  %v814_v21 = vsel %vm90_vm0, %v786_v24, 0.0  ;;  %v3819_v24 = vsel %vm1774_vm6, %v1766_v19, %v1782_v30  ;;  %v1784_v63 = vmul.f32 0.2, %v1768_v1 }
 0x4bc   :  { %2625 = vrcp.f32 %v1741_v48  ;;  %812 = vadd.xlane.f32.xlu0 %v811_v6  ;;  %815 = vadd.xlane.f32.xlu1 %v814_v21  ;;  %v788_v7 = vpop.permute.xlu1 %787  ;;  %v3824_v6 = vld [vmem:[%s4143_s19 + $0x28] sm:$0xff]  ;;  %vm1776_vm7 = vcmp.ge.f32.partialorder %v1768_v1, 0.0  ;;  %v553_v19 = vadd.f32 1e-05, %v545_v56  ;;  %v552_v48 = vadd.f32 1e-05, %v544_v31 }
 0x4bd   :  { %v2620_v3 = vpop.eup %2619  ;;  %v817_v28 = vsel %vm90_vm0, %v788_v7, 0.0  ;;  %v1801_v21 = vsel %vm90_vm0, %v3816_v43, 0.0  ;;  %v1798_v54 = vsel %vm90_vm0, %v3819_v24, 0.0  ;;  %v3838_v61 = vsel %vm1776_vm7, %v1768_v1, %v1784_v63 }
 0x4be   :  { %v2622_v5 = vpop.eup %2621  ;;  %v790_v38 = vpop.permute.xlu0 %789  ;;  %v1761_v53 = vmul.f32 %v2620_v3, %v3566_v50  ;;  %v3840_v30 = vsel %vm1777_vm8, %v1769_v13, %v1785_v40  ;;  %2627 = vrsqrt.f32 %v553_v19  ;;  %v1804_v1 = vsel %vm90_vm0, %v3838_v61, 0.0 }
 0x4bf   :  { %v820_v37 = vsel %vm90_vm0, %v790_v38, 0.0  ;;  %v1759_v39 = vmul.f32 %v2622_v5, %v3564_v59  ;;  %v3831_v59 = vld [vmem:[%s4143_s19 + $0x20] sm:$0xff]  ;;  %v547_v38 = vmul.f32 0.03125, %v3744_v49  ;;  %v1807_v13 = vsel %vm90_vm0, %v3840_v30, 0.0 }
 0x4c0   :  { %818 = vadd.xlane.f32.xlu0 %v817_v28  ;;  %821 = vadd.xlane.f32.xlu1 %v820_v37  ;;  %v1771_v50 = vadd.f32 %v3824_v6, %v1761_v53  ;;  %v554_v28 = vadd.f32 1e-05, %v546_v47  ;;  %v548_v53 = vmul.f32 0.03125, %v3750_v9  ;;  %2629 = vrsqrt.f32 %v552_v48  ;;  %v3857_v9 = vld [vmem:[%s4143_s19 + $0x38] sm:$0xff] }
 0x4c1   :  { %v1770_v44 = vadd.f32 %v3831_v59, %v1759_v39  ;;  %v555_v63 = vadd.f32 1e-05, %v547_v38  ;;  %v549_v40 = vmul.f32 0.03125, %v3748_v52 }
 0x4c2   :  { %v1787_v7 = vmul.f32 0.2, %v1771_v50  ;;  %vm1779_vm10 = vcmp.ge.f32.partialorder %v1771_v50, 0.0  ;;  %2631 = vrsqrt.f32 %v554_v28  ;;  %v551_v28 = vmul.f32 0.03125, %v3752_v10  ;;  %v2120_v10 = vld [vmem:[%s4130_s13] ss:$0 sm:$0xff] }
 0x4c3   :  { %v1786_v3 = vmul.f32 0.2, %v1770_v44  ;;  %vm1778_vm9 = vcmp.ge.f32.partialorder %v1770_v44, 0.0  ;;  %v557_v38 = vadd.f32 1e-05, %v549_v40 }
 0x4c4   :  { %1802 = vadd.xlane.f32.xlu0 %v1801_v21  ;;  %1799 = vadd.xlane.f32.xlu1 %v1798_v54  ;;  %v3852_v39 = vsel %vm1779_vm10, %v1771_v50, %v1787_v7  ;;  %v556_v50 = vadd.f32 1e-05, %v548_v53 }
 0x4c5   :  { %v2624_v5 = vpop.eup %2623  ;;  %v3850_v49 = vsel %vm1778_vm9, %v1770_v44, %v1786_v3  ;;  %v550_v44 = vmul.f32 0.03125, %v3754_v33  ;;  %v1813_v21 = vsel %vm90_vm0, %v3852_v39, 0.0 }
 0x4c6   :  { %v2626_v56 = vpop.eup %2625  ;;  %v1765_v31 = vmul.f32 %v2624_v5, %v3570_v42  ;;  %v1810_v48 = vsel %vm90_vm0, %v3850_v49, 0.0  ;;  %2633 = vrsqrt.f32 %v556_v50 }
 0x4c7   :  { %v1763_v37 = vmul.f32 %v2626_v56, %v3568_v51  ;;  %v3864_v51 = vld [vmem:[%s4143_s19 + $0x30] sm:$0xff]  ;;  %v558_v33 = vadd.f32 1e-05, %v550_v44  ;;  %2635 = vrsqrt.f32 %v555_v63 }
 0x4c8   :  { %1805 = vadd.xlane.f32.xlu0 %v1804_v1  ;;  %1808 = vadd.xlane.f32.xlu1 %v1807_v13  ;;  %v1773_v42 = vadd.f32 %v3857_v9, %v1765_v31  ;;  %v2628_v56 = vpop.eup %2627  ;;  %v559_v1 = vadd.f32 1e-05, %v551_v28 }
 0x4c9   :  { %v1772_v47 = vadd.f32 %v3864_v51, %v1763_v37  ;;  %2637 = vrsqrt.f32 %v558_v33  ;;  %v569_v13 = vmul.f32 %v2628_v56, %v3597_v27  ;;  %v2119_v37 = vld [vmem:[%s4129_s12] ss:$0 sm:$0xff] }
 0x4ca   :  { %vm1781_vm11 = vcmp.ge.f32.partialorder %v1773_v42, 0.0  ;;  %v1789_v19 = vmul.f32 0.2, %v1773_v42  ;;  %v2630_v53 = vpop.eup %2629  ;;  %2639 = vrsqrt.f32 %v557_v38 }
 0x4cb   :  { %vm1780_vm12 = vcmp.ge.f32.partialorder %v1772_v47, 0.0  ;;  %v1788_v52 = vmul.f32 0.2, %v1772_v47  ;;  %2641 = vrsqrt.f32 %v559_v1 }
 0x4cc   :  { %1811 = vadd.xlane.f32.xlu0 %v1810_v48  ;;  %1814 = vadd.xlane.f32.xlu1 %v1813_v21  ;;  %v3872_v54 = vsel %vm1781_vm11, %v1773_v42, %v1789_v19  ;;  %v2632_v31 = vpop.eup %2631  ;;  %v584_v42 = vmul.f32 %v2119_v37, %v569_v13 }
 0x4cd   :  { %v3874_v3 = vsel %vm1780_vm12, %v1772_v47, %v1788_v52  ;;  %v1819_v7 = vsel %vm90_vm0, %v3872_v54, 0.0  ;;  %v570_v63 = vmul.f32 %v2632_v31, %v3611_v41  ;;  %v568_v47 = vmul.f32 %v2630_v53, %v3600_v62 }
 0x4ce   :  { %v1816_v5 = vsel %vm90_vm0, %v3874_v3, 0.0  ;;  %v599_v44 = vadd.f32 %v2120_v10, %v584_v42 }
 0x4cf   :  { %v585_v19 = vmul.f32 %v2119_v37, %v570_v63  ;;  %v583_v21 = vmul.f32 %v2119_v37, %v568_v47 }
 0x4d0   :  { %1817 = vadd.xlane.f32.xlu0 %v1816_v5  ;;  %1820 = vadd.xlane.f32.xlu1 %v1819_v7  ;;  %v2634_v40 = vpop.eup %2633  ;;  %v1941_v41 = vadd.f32 %v3786_v60, %v599_v44 }
 0x4d1   :  { %v2636_v50 = vpop.eup %2635  ;;  %v572_v27 = vmul.f32 %v2634_v40, %v3623_v36  ;;  %v600_v5 = vadd.f32 %v2120_v10, %v585_v19  ;;  %v598_v56 = vadd.f32 %v2120_v10, %v583_v21 }
 0x4d2   :  { %v571_v52 = vmul.f32 %v2636_v50, %v3607_v4 }
 0x4d3   :  { %v2638_v48 = vpop.eup %2637  ;;  %v587_v38 = vmul.f32 %v2119_v37, %v572_v27  ;;  %v1942_v36 = vadd.f32 %v3801_v20, %v600_v5  ;;  %v1940_v13 = vadd.f32 %v3793_v12, %v598_v56 }
 0x4d4   :  { %v2640_v7 = vpop.eup %2639  ;;  %v574_v33 = vmul.f32 %v2638_v48, %v3635_v15  ;;  %v586_v62 = vmul.f32 %v2119_v37, %v571_v52 }
 0x4d5   :  { %v573_v28 = vmul.f32 %v2640_v7, %v3619_v34  ;;  %v2642_v53 = vpop.eup %2641  ;;  %v602_v31 = vadd.f32 %v2120_v10, %v587_v38 }
 0x4d6   :  { %v589_v1 = vmul.f32 %v2119_v37, %v574_v33  ;;  %v575_v4 = vmul.f32 %v2642_v53, %v3631_v11  ;;  %v601_v15 = vadd.f32 %v2120_v10, %v586_v62 }
 0x4d7   :  { %v588_v42 = vmul.f32 %v2119_v37, %v573_v28  ;;  %v1944_v34 = vadd.f32 %v3831_v59, %v602_v31 }
 0x4d8   :  { %v604_v60 = vadd.f32 %v2120_v10, %v589_v1  ;;  %v1943_v63 = vadd.f32 %v3807_v32, %v601_v15  ;;  %v590_v47 = vmul.f32 %v2119_v37, %v575_v4 }
 0x4d9   :  { %v603_v40 = vadd.f32 %v2120_v10, %v588_v42 }
 0x4da   :  { %v1946_v11 = vadd.f32 %v3864_v51, %v604_v60  ;;  %v605_v20 = vadd.f32 %v2120_v10, %v590_v47 }
 0x4db   :  { %v1945_v12 = vadd.f32 %v3824_v6, %v603_v40 }
 0x4dc   :  { %v1947_v59 = vadd.f32 %v3857_v9, %v605_v20 }
 0x4e1   :  { %1990 = vrot.lane.b32.xlu1 %v1941_v41, %s2725_s0 }
 0x4e5   :  { %1992 = vrot.lane.b32.xlu1 %v1942_v36, %s2725_s0 }
 0x4e6   :  { %1988 = vrot.lane.b32.xlu0 %v1940_v13, %s2725_s0 }
 0x4e9   :  { %1996 = vrot.lane.b32.xlu1 %v1944_v34, %s2725_s0 }
 0x4ea   :  { %1994 = vrot.lane.b32.xlu0 %v1943_v63, %s2725_s0 }
 0x4ed   :  { %2000 = vrot.lane.b32.xlu1 %v1946_v11, %s2725_s0 }
 0x4ee   :  { %1998 = vrot.lane.b32.xlu0 %v1945_v12, %s2725_s0 }
 0x4f2   :  { %2002 = vrot.lane.b32.xlu0 %v1947_v59, %s2725_s0 }
 0x53f   :  { %v804_v32 = vpop.xlane.xlu1 %803 }
 0x540   :  { %v824_v50 = vmul.f32 0.03125, %v804_v32 }
 0x541   :  { %v801_v37 = vpop.xlane.xlu0 %800 }
 0x542   :  { %v823_v44 = vmul.f32 0.03125, %v801_v37  ;;  %v832_v19 = vadd.f32 1e-05, %v824_v50 }
 0x544   :  { %v831_v27 = vadd.f32 1e-05, %v823_v44  ;;  %2643 = vrsqrt.f32 %v832_v19 }
 0x545   :  { %v807_v48 = vpop.xlane.xlu0 %806 }
 0x546   :  { %2645 = vrsqrt.f32 %v831_v27  ;;  %v825_v51 = vmul.f32 0.03125, %v807_v48 }
 0x548   :  { %v833_v6 = vadd.f32 1e-05, %v825_v51 }
 0x549   :  { %v813_v38 = vpop.xlane.xlu0 %812 }
 0x54a   :  { %2647 = vrsqrt.f32 %v833_v6  ;;  %v827_v6 = vmul.f32 0.03125, %v813_v38 }
 0x54d   :  { %v819_v31 = vpop.xlane.xlu0 %818 }
 0x54e   :  { %v2644_v10 = vpop.eup %2643 }
 0x54f   :  { %v848_v52 = vmul.f32 %v2644_v10, %v3670_v8 }
 0x550   :  { %v2646_v21 = vpop.eup %2645 }
 0x551   :  { %v847_v9 = vmul.f32 %v2646_v21, %v3693_v29  ;;  %v865_v7 = vmul.f32 %v3758_v16, %v848_v52  ;;  %v810_v29 = vpop.xlane.xlu1 %809 }
 0x552   :  { %v826_v12 = vmul.f32 0.03125, %v810_v29 }
 0x553   :  { %v864_v33 = vmul.f32 %v3758_v16, %v847_v9  ;;  %v882_v41 = vadd.f32 %v3756_v35, %v865_v7 }
 0x554   :  { %v2648_v5 = vpop.eup %2647 }
 0x555   :  { %v881_v28 = vadd.f32 %v3756_v35, %v864_v33  ;;  %v849_v56 = vmul.f32 %v2648_v5, %v3683_v46  ;;  %v1973_v62 = vadd.f32 %v3762_v55, %v882_v41  ;;  %v816_v4 = vpop.xlane.xlu1 %815  ;;  %v1803_v46 = vpop.xlane.xlu0 %1802  ;;  %v835_v41 = vadd.f32 1e-05, %v827_v6 }
 0x556   :  { %v1823_v15 = vmul.f32 0.03125, %v1803_v46  ;;  %v828_v27 = vmul.f32 0.03125, %v816_v4  ;;  %v829_v5 = vmul.f32 0.03125, %v819_v31 }
 0x557   :  { %v1972_v53 = vadd.f32 %v3760_v18, %v881_v28  ;;  %2022 = vrot.lane.b32.xlu0 %v1973_v62, %s2725_s0  ;;  %v866_v8 = vmul.f32 %v3758_v16, %v849_v56 }
 0x558   :  { %v3927_v34 = vsub.f32 %v3816_v43, %v1823_v15  ;;  %v836_v52 = vadd.f32 1e-05, %v828_v27 }
 0x559   :  { %2020 = vrot.lane.b32.xlu1 %v1972_v53, %s2725_s0  ;;  %v883_v36 = vadd.f32 %v3756_v35, %v866_v8  ;;  %v822_v13 = vpop.xlane.xlu1 %821  ;;  %v1806_v55 = vpop.xlane.xlu0 %1805  ;;  %v837_v8 = vadd.f32 1e-05, %v829_v5 }
 0x55a   :  { %v1824_v60 = vmul.f32 0.03125, %v1806_v55  ;;  %v830_v9 = vmul.f32 0.03125, %v822_v13 }
 0x55b   :  { %v1974_v1 = vadd.f32 %v3764_v45, %v883_v36  ;;  %v1839_v45 = vmul.f32 %v3927_v34, %v3927_v34 }
 0x55c   :  { %v3930_v40 = vsub.f32 %v3838_v61, %v1824_v60  ;;  %v834_v61 = vadd.f32 1e-05, %v826_v12  ;;  %v838_v62 = vadd.f32 1e-05, %v830_v9 }
 0x55d   :  { %2024 = vrot.lane.b32.xlu1 %v1974_v1, %s2725_s0  ;;  %v1800_v18 = vpop.xlane.xlu1 %1799  ;;  %v1812_v42 = vpop.xlane.xlu0 %1811  ;;  %v1849_v50 = vsel %vm90_vm0, %v1839_v45, 0.0 }
 0x55e   :  { %v1826_v47 = vmul.f32 0.03125, %v1812_v42  ;;  %v1822_v20 = vmul.f32 0.03125, %v1800_v18  ;;  %v1840_v43 = vmul.f32 %v3930_v40, %v3930_v40  ;;  %2649 = vrsqrt.f32 %v834_v61 }
 0x55f   :  { %2651 = vrsqrt.f32 %v836_v52 }
 0x560   :  { %v3935_v59 = vsub.f32 %v3850_v49, %v1826_v47  ;;  %v3941_v44 = vsub.f32 %v3819_v24, %v1822_v20  ;;  %v1852_v49 = vsel %vm90_vm0, %v1840_v43, 0.0  ;;  %2653 = vrsqrt.f32 %v835_v41 }
 0x561   :  { %v1809_v63 = vpop.xlane.xlu1 %1808  ;;  %v1818_v11 = vpop.xlane.xlu0 %1817  ;;  %2655 = vrsqrt.f32 %v838_v62 }
 0x562   :  { %v1828_v32 = vmul.f32 0.03125, %v1818_v11  ;;  %v1825_v19 = vmul.f32 0.03125, %v1809_v63  ;;  %v1842_v51 = vmul.f32 %v3935_v59, %v3935_v59  ;;  %v1838_v24 = vmul.f32 %v3941_v44, %v3941_v44 }
 0x563   :  { %2657 = vrsqrt.f32 %v837_v8 }
 0x564   :  { %v3944_v48 = vsub.f32 %v3874_v3, %v1828_v32  ;;  %v3950_v10 = vsub.f32 %v3840_v30, %v1825_v19  ;;  %v1858_v3 = vsel %vm90_vm0, %v1842_v51, 0.0  ;;  %v1846_v28 = vsel %vm90_vm0, %v1838_v24, 0.0 }
 0x565   :  { %v1815_v37 = vpop.xlane.xlu1 %1814 }
 0x566   :  { %v1827_v21 = vmul.f32 0.03125, %v1815_v37  ;;  %v1844_v33 = vmul.f32 %v3944_v48, %v3944_v48  ;;  %v1841_v56 = vmul.f32 %v3950_v10, %v3950_v10 }
 0x568   :  { %v3958_v38 = vsub.f32 %v3852_v39, %v1827_v21  ;;  %v1864_v53 = vsel %vm90_vm0, %v1844_v33, 0.0  ;;  %v1855_v39 = vsel %vm90_vm0, %v1841_v56, 0.0  ;;  %v2650_v31 = vpop.eup %2649 }
 0x569   :  { %v1821_v7 = vpop.xlane.xlu1 %1820  ;;  %v850_v46 = vmul.f32 %v2650_v31, %v3708_v2  ;;  %v2652_v13 = vpop.eup %2651 }
 0x56a   :  { %v1829_v30 = vmul.f32 0.03125, %v1821_v7  ;;  %v1843_v36 = vmul.f32 %v3958_v38, %v3958_v38  ;;  %v2654_v55 = vpop.eup %2653  ;;  %v852_v15 = vmul.f32 %v2652_v13, %v3721_v23 }
 0x56b   :  { %v867_v18 = vmul.f32 %v3758_v16, %v850_v46  ;;  %v2656_v42 = vpop.eup %2655  ;;  %v851_v60 = vmul.f32 %v2654_v55, %v3698_v26  ;;  %v4024_v46 = vld [vmem:[%s4134_s17] ss:$0 sm:$0xff] }
 0x56c   :  { %v3965_v29 = vsub.f32 %v3872_v54, %v1829_v30  ;;  %v1861_v1 = vsel %vm90_vm0, %v1843_v36, 0.0  ;;  %v854_v47 = vmul.f32 %v2656_v42, %v3731_v25  ;;  %v869_v11 = vmul.f32 %v3758_v16, %v852_v15 }
 0x56d   :  { %v2658_v63 = vpop.eup %2657  ;;  %v884_v45 = vadd.f32 %v3756_v35, %v867_v18  ;;  %v868_v12 = vmul.f32 %v3758_v16, %v851_v60 }
 0x56e   :  { %v1845_v4 = vmul.f32 %v3965_v29, %v3965_v29  ;;  %v853_v2 = vmul.f32 %v2658_v63, %v3715_v58  ;;  %v886_v23 = vadd.f32 %v3756_v35, %v869_v11  ;;  %v871_v32 = vmul.f32 %v3758_v16, %v854_v47 }
 0x56f   :  { %v1975_v20 = vadd.f32 %v3766_v14, %v884_v45  ;;  %v885_v26 = vadd.f32 %v3756_v35, %v868_v12 }
 0x570   :  { %v1867_v54 = vsel %vm90_vm0, %v1845_v4, 0.0  ;;  %v870_v25 = vmul.f32 %v3758_v16, %v853_v2  ;;  %v888_v43 = vadd.f32 %v3756_v35, %v871_v32  ;;  %v3999_v16 = vpop.permute.xlu0 %1988 }
 0x571   :  { %v1976_v58 = vadd.f32 %v3768_v57, %v885_v26 }
 0x572   :  { %v887_v14 = vadd.f32 %v3756_v35, %v870_v25  ;;  %v1979_v37 = vadd.f32 %v3774_v0, %v888_v43  ;;  %v2692_v25 = vld [vmem:[%s4142_s30 + $0x10] sm:$0xff] }
 0x574   :  { %v1978_v61 = vadd.f32 %v3772_v22, %v887_v14  ;;  %v4001_v19 = vpop.permute.xlu0 %1994 }
 0x576   :  { %1850 = vadd.xlane.f32.xlu0 %v1849_v50  ;;  %v1977_v50 = vadd.f32 %v3770_v17, %v886_v23  ;;  %v1991_v17 = vpop.permute.xlu1 %1990 }
 0x578   :  { %v4005_v27 = vpop.permute.xlu0 %1998 }
 0x57a   :  { %1853 = vadd.xlane.f32.xlu0 %v1852_v49  ;;  %v4003_v57 = vpop.permute.xlu1 %1992 }
 0x57c   :  { %v4009_v49 = vpop.permute.xlu0 %2002 }
 0x57e   :  { %1859 = vadd.xlane.f32.xlu0 %v1858_v3  ;;  %v4007_v35 = vpop.permute.xlu1 %1996 }
 0x581   :  { %1847 = vadd.xlane.f32.xlu1 %v1846_v28 }
 0x582   :  { %1865 = vadd.xlane.f32.xlu0 %v1864_v53  ;;  %v4011_v51 = vpop.permute.xlu1 %2000 }
 0x585   :  { %1856 = vadd.xlane.f32.xlu1 %v1855_v39  ;;  %v4018_v39 = vld [vmem:[%s4133_s16] ss:$0 sm:$0xff] }
 0x589   :  { %1862 = vadd.xlane.f32.xlu1 %v1861_v1 }
 0x58d   :  { %1868 = vadd.xlane.f32.xlu1 %v1867_v54 }
 0x598   :  { %2026 = vrot.lane.b32.xlu0 %v1975_v20, %s2725_s0 }
 0x59c   :  { %2030 = vrot.lane.b32.xlu0 %v1977_v50, %s2725_s0 }
 0x59e   :  { %2028 = vrot.lane.b32.xlu1 %v1976_v58, %s2725_s0 }
 0x5a0   :  { %2034 = vrot.lane.b32.xlu0 %v1979_v37, %s2725_s0 }
 0x5a2   :  { %2032 = vrot.lane.b32.xlu1 %v1978_v61, %s2725_s0 }
 0x5c9   :  { %v2023_v0 = vpop.permute.xlu0 %2022 }
 0x5cb   :  { %v4013_v6 = vpop.permute.xlu1 %2020 }
 0x5cf   :  { %v2025_v7 = vpop.permute.xlu1 %2024 }
 0x603   :  { %v1851_v22 = vpop.xlane.xlu0 %1850 }
 0x604   :  { %v1871_v21 = vmul.f32 0.03125, %v1851_v22 }
 0x606   :  { %v1879_v24 = vadd.f32 1e-05, %v1871_v21 }
 0x607   :  { %v1854_v52 = vpop.xlane.xlu0 %1853 }
 0x608   :  { %2659 = vrsqrt.f32 %v1879_v24  ;;  %v1872_v9 = vmul.f32 0.03125, %v1854_v52 }
 0x60a   :  { %v1880_v3 = vadd.f32 1e-05, %v1872_v9 }
 0x60b   :  { %v1860_v33 = vpop.xlane.xlu0 %1859 }
 0x60c   :  { %2661 = vrsqrt.f32 %v1880_v3  ;;  %v1874_v41 = vmul.f32 0.03125, %v1860_v33 }
 0x60e   :  { %v1882_v5 = vadd.f32 1e-05, %v1874_v41  ;;  %v1848_v30 = vpop.xlane.xlu1 %1847 }
 0x60f   :  { %v1870_v28 = vmul.f32 0.03125, %v1848_v30  ;;  %v1866_v56 = vpop.xlane.xlu0 %1865 }
 0x610   :  { %2663 = vrsqrt.f32 %v1882_v5  ;;  %v1876_v62 = vmul.f32 0.03125, %v1866_v56  ;;  %v2694_v5 = vld [vmem:[%s4142_s30] sm:$0xff] }
 0x611   :  { %v1878_v53 = vadd.f32 1e-05, %v1870_v28 }
 0x612   :  { %v2660_v8 = vpop.eup %2659  ;;  %v1884_v36 = vadd.f32 1e-05, %v1876_v62  ;;  %v1857_v31 = vpop.xlane.xlu1 %1856 }
 0x613   :  { %v1895_v1 = vmul.f32 %v2660_v8, %v3927_v34  ;;  %2665 = vrsqrt.f32 %v1878_v53  ;;  %v1873_v4 = vmul.f32 0.03125, %v1857_v31  ;;  %v2691_v34 = vld [vmem:[%s4142_s30 + $0x8] sm:$0xff] }
 0x614   :  { %2667 = vrsqrt.f32 %v1884_v36 }
 0x615   :  { %v1910_v13 = vmul.f32 %v4018_v39, %v1895_v1  ;;  %v1881_v54 = vadd.f32 1e-05, %v1873_v4  ;;  %v2027_v4 = vpop.permute.xlu0 %2026 }
 0x616   :  { %v2662_v55 = vpop.eup %2661  ;;  %v1863_v15 = vpop.xlane.xlu1 %1862 }
 0x617   :  { %v1925_v18 = vadd.f32 %v4024_v46, %v1910_v13  ;;  %v1896_v42 = vmul.f32 %v2662_v55, %v3930_v40  ;;  %2669 = vrsqrt.f32 %v1881_v54  ;;  %v1875_v60 = vmul.f32 0.03125, %v1863_v15  ;;  %v2696_v55 = vld [vmem:[%s4142_s30 + $0x18] sm:$0xff] }
 0x619   :  { %v1933_v63 = vadd.f32 %v2691_v34, %v1925_v18  ;;  %v1911_v47 = vmul.f32 %v4018_v39, %v1896_v42  ;;  %v1883_v45 = vadd.f32 1e-05, %v1875_v60 }
 0x61a   :  { %v2664_v11 = vpop.eup %2663  ;;  %v1869_v2 = vpop.xlane.xlu1 %1868 }
 0x61b   :  { %v2045_v12 = vsel %vm90_vm0, %v1933_v63, %v1991_v17  ;;  %v1926_v20 = vadd.f32 %v4024_v46, %v1911_v47  ;;  %v1898_v23 = vmul.f32 %v2664_v11, %v3935_v59  ;;  %2671 = vrsqrt.f32 %v1883_v45  ;;  %v2697_v45 = vld [vmem:[%s4142_s30 + $0x28] sm:$0xff] }
 0x61c   :  { %v2053_v40 = vsel %vm1176_vm2, %v2045_v12, %v2023_v0  ;;  %v1877_v32 = vmul.f32 0.03125, %v1869_v2  ;;  %v2031_v2 = vpop.permute.xlu0 %2030 }
 0x61d   :  { %v2666_v26 = vpop.eup %2665  ;;  %v1934_v50 = vadd.f32 %v2692_v25, %v1926_v20  ;;  %v2062_v43 = vsel %vm2060_vm13, %v2053_v40, 0.0  ;;  %v1913_v58 = vmul.f32 %v4018_v39, %v1898_v23  ;;  %v2698_v40 = vld [vmem:[%s4142_s30 + $0x38] sm:$0xff] }
 0x61e   :  { %v2668_v14 = vpop.eup %2667  ;;  %v1894_v37 = vmul.f32 %v2666_v26, %v3941_v44  ;;  %2070 = vst [vmem:[#allocation2 + $0x8] sm:$0xff] %v2062_v43  ;;  %v1885_v61 = vadd.f32 1e-05, %v1877_v32  ;;  %v2029_v9 = vpop.permute.xlu1 %2028  ;;  %v2693_v44 = vld [vmem:[%s4142_s30 + $0x20] sm:$0xff] }
 0x61f   :  { %v2046_v59 = vsel %vm90_vm0, %v1934_v50, %v4003_v57  ;;  %v1900_v17 = vmul.f32 %v2668_v14, %v3944_v48  ;;  %v1928_v0 = vadd.f32 %v4024_v46, %v1913_v58 }
 0x620   :  { %v2054_v22 = vsel %vm1176_vm2, %v2046_v59, %v2025_v7  ;;  %v1909_v21 = vmul.f32 %v4018_v39, %v1894_v37  ;;  %2673 = vrsqrt.f32 %v1885_v61  ;;  %v2035_v26 = vpop.permute.xlu0 %2034 }
 0x621   :  { %v2670_v24 = vpop.eup %2669  ;;  %v2063_v52 = vsel %vm2060_vm13, %v2054_v22, 0.0  ;;  %v1936_v3 = vadd.f32 %v2693_v44, %v1928_v0  ;;  %v1915_v57 = vmul.f32 %v4018_v39, %v1900_v17 }
 0x622   :  { %v1924_v48 = vadd.f32 %v4024_v46, %v1909_v21  ;;  %v1897_v33 = vmul.f32 %v2670_v24, %v3950_v10  ;;  %2071 = vst [vmem:[#allocation2 + $0x10] sm:$0xff] %v2063_v52  ;;  %v2695_v10 = vld [vmem:[%s4142_s30 + $0x30] sm:$0xff]  ;;  %v2033_v13 = vpop.permute.xlu1 %2032 }
 0x623   :  { %v2048_v7 = vsel %vm90_vm0, %v1936_v3, %v4007_v35  ;;  %v1930_v41 = vadd.f32 %v4024_v46, %v1915_v57 }
 0x624   :  { %v1932_v30 = vadd.f32 %v2694_v5, %v1924_v48  ;;  %v1912_v28 = vmul.f32 %v4018_v39, %v1897_v33  ;;  %v2056_v56 = vsel %vm1176_vm2, %v2048_v7, %v2029_v9 }
 0x625   :  { %v2672_v62 = vpop.eup %2671  ;;  %v2065_v53 = vsel %vm2060_vm13, %v2056_v56, 0.0  ;;  %v1938_v8 = vadd.f32 %v2695_v10, %v1930_v41 }
 0x626   :  { %v2044_v35 = vsel %vm90_vm0, %v1932_v30, %v3999_v16  ;;  %v1927_v36 = vadd.f32 %v4024_v46, %v1912_v28  ;;  %v1899_v31 = vmul.f32 %v2672_v62, %v3958_v38  ;;  %2073 = vst [vmem:[#allocation2 + $0x20] sm:$0xff] %v2065_v53 }
 0x627   :  { %v2052_v1 = vsel %vm1176_vm2, %v2044_v35, %v4013_v6  ;;  %v2050_v54 = vsel %vm90_vm0, %v1938_v8, %v4011_v51 }
 0x628   :  { %v1935_v15 = vadd.f32 %v2696_v55, %v1927_v36  ;;  %v2061_v16 = vsel %vm2060_vm13, %v2052_v1, 0.0  ;;  %v1914_v18 = vmul.f32 %v4018_v39, %v1899_v31  ;;  %v2058_v38 = vsel %vm1176_vm2, %v2050_v54, %v2033_v13 }
 0x629   :  { %2069 = vst [vmem:[#allocation2] sm:$0xff] %v2061_v16  ;;  %v2067_v42 = vsel %vm2060_vm13, %v2058_v38, 0.0 }
 0x62a   :  { %v2674_v6 = vpop.eup %2673  ;;  %v2047_v60 = vsel %vm90_vm0, %v1935_v15, %v4001_v19  ;;  %v1929_v51 = vadd.f32 %v4024_v46, %v1914_v18  ;;  %2075 = vst [vmem:[#allocation2 + $0x30] sm:$0xff] %v2067_v42 }
 0x62b   :  { %v2055_v34 = vsel %vm1176_vm2, %v2047_v60, %v2027_v4  ;;  %v1901_v63 = vmul.f32 %v2674_v6, %v3965_v29 }
 0x62c   :  { %v2064_v47 = vsel %vm2060_vm13, %v2055_v34, 0.0  ;;  %v1937_v11 = vadd.f32 %v2697_v45, %v1929_v51 }
 0x62d   :  { %2072 = vst [vmem:[#allocation2 + $0x18] sm:$0xff] %v2064_v47  ;;  %v1916_v12 = vmul.f32 %v4018_v39, %v1901_v63 }
 0x62e   :  { %v2049_v19 = vsel %vm90_vm0, %v1937_v11, %v4005_v27 }
 0x62f   :  { %v2057_v20 = vsel %vm1176_vm2, %v2049_v19, %v2031_v2  ;;  %v1931_v23 = vadd.f32 %v4024_v46, %v1916_v12 }
 0x630   :  { %v2066_v29 = vsel %vm2060_vm13, %v2057_v20, 0.0 }
 0x631   :  { %2074 = vst [vmem:[#allocation2 + $0x28] sm:$0xff] %v2066_v29  ;;  %v1939_v32 = vadd.f32 %v2698_v40, %v1931_v23 }
 0x633   :  { %v2051_v39 = vsel %vm90_vm0, %v1939_v32, %v4009_v49 }
 0x634   :  { %v2059_v27 = vsel %vm1176_vm2, %v2051_v39, %v2035_v26 }
 0x635   :  { %v2068_v25 = vsel %vm2060_vm13, %v2059_v27, 0.0 }
 0x636   :  { %2076 = vst [vmem:[#allocation2 + $0x38] sm:$0xff] %v2068_v25 }
 0x637   :  { %2710 = shalt.err (!%p2707_p4)
}
 0x638   :  { %s2711_s29 = scalar_lea.hbm %s4135_s18, 1024 }
 0x639   :  { %p2712_p5 = scmp.ne.s32.totalorder %s4135_s18, %s2711_s29  ;;  %p2715_p6 = scmp.lt.u32.totalorder %s2711_s29, %s4135_s18 }
 0x63b   :  { %p2717_p7 = pnand %p2715_p6, %p2712_p5 }
 0x63d   :  { %2720 = shalt.err (!%p2717_p7)
}
 0x63e   :  { %s2728_s12 = smov 128   ;;  %s2729_s13 = smov 8  }
 0x63f   :  { %2088 = dma.vmem_to_hbm [thread:$0]  %s2083_s26, 1024, %s4135_s18, [#allocation3], %s2728_s12, %s2728_s12, %s2729_s13  }
 0x640   :  { %2721 = dma.done.wait [#allocation3], 1024  }
 0x641   :  { %2722 = vsyncadd [#allocation3], 4294966272 }
 0x642   :  { %2092 = vsyncpa [#allocation3], 1 }

</bundles_post_ra>
